<compile_context>
chip_gen: v5e
topology: v5e:2x2
jax: 0.10.0
libtpu: 0.0.40
codegen_flags: <defaults>
</compile_context>

<pallas_src>
import jax
import jax.numpy as jnp
import numpy as np
from jax import lax
from jax.experimental import pallas as pl
from jax.experimental.pallas import tpu as pltpu


def _round_up(x, m):
    return ((x + m - 1) // m) * m


def cnn_kernel(x_ref, w1_ref, b1_ref, w2_ref, b2_ref, w3_ref, b3_ref,
               wl_ref, bl_ref, out_ref):
    # Four chained lane-dense matmuls; all intermediates stay in vregs/VMEM.
    x = x_ref[...]                                                  # (TB, 64)
    h1 = jnp.maximum(
        jnp.dot(x, w1_ref[...], preferred_element_type=jnp.float32)
        + b1_ref[...], 0.0)                                         # (TB, 576)
    h2 = jnp.maximum(
        jnp.dot(h1, w2_ref[...], preferred_element_type=jnp.float32)
        + b2_ref[...], 0.0)                                         # (TB, 512)
    h3 = jnp.maximum(
        jnp.dot(h2, w3_ref[...], preferred_element_type=jnp.float32)
        + b3_ref[...], 0.0)                                         # (TB, 256)
    out_ref[...] = (
        jnp.dot(h3, wl_ref[...], preferred_element_type=jnp.float32)
        + bl_ref[...])                                              # (TB, 128)


def cnn_forward(x_nchw, kernel_params, *, tb=256):
    """x_nchw: (N, 1, 8, 8) float32 -> logits (N, 10) float32."""
    (w1l, b1f, w2l, b2f, w3l, b3f, wlk, blk) = kernel_params
    n = x_nchw.shape[0]
    # C=1, so NCHW flatten == (h, w) row-major == the (h, w, c) order the
    # lowered matrices were built with.  Lane-dense (N, 64) input slab.
    x2d = x_nchw.reshape(n, 64)

    # Batch tile: multiple of 8 (sublane alignment).
    n8 = _round_up(n, 8)
    tb = max(8, min(tb, n8))
    # Prefer >= 2 grid steps when the batch allows it so the "parallel" grid
    # axis can actually feed both TensorCores on v7x.
    if tb >= n8 and n8 >= 16:
        tb = _round_up(n8 // 2, 8)
    n_pad = _round_up(n, tb)
    if n_pad != n:
        x2d = jnp.pad(x2d, ((0, n_pad - n), (0, 0)))
    grid = (n_pad // tb,)

    weights = (w1l, b1f, w2l, b2f, w3l, b3f, wlk, blk)

    def const_spec(a):
        nd = a.ndim
        # Resident weights (constant index_map); small enough that default
        # double-buffering is harmless.  (pl.Buffered(1) could single-buffer
        # them if VMEM headroom ever matters.)
        return pl.BlockSpec(a.shape, lambda i, _nd=nd: (0,) * _nd)

    in_specs = ([pl.BlockSpec((tb, 64), lambda i: (i, 0))]
                + [const_spec(a) for a in weights])
    out_spec = pl.BlockSpec((tb, 128), lambda i: (i, 0))

    flops = 2 * n_pad * (64 * 576 + 576 * 512 + 512 * 256 + 256 * 128)
    bytes_accessed = 4 * (x2d.size + sum(a.size for a in weights)
                          + n_pad * 128)
    cost = pl.CostEstimate(flops=flops, transcendentals=0,
                           bytes_accessed=bytes_accessed)

    out = pl.pallas_call(
        cnn_kernel,
        out_shape=jax.ShapeDtypeStruct((n_pad, 128), jnp.float32),
        grid=grid,
        in_specs=in_specs,
        out_specs=out_spec,
        compiler_params=pltpu.CompilerParams(
            dimension_semantics=("parallel",),
            vmem_limit_bytes=32 * 1024 * 1024),
        cost_estimate=cost,
    )(x2d, *weights)
    return out[:n, :10]


def init_pt_params(key):
    """Deterministic parameters in PyTorch conventions (OIHW conv, (out,in) linear)."""
    ks = jax.random.split(key, 8)
    w1 = jax.random.normal(ks[0], (16, 1, 3, 3), jnp.float32) * 0.30
    b1 = jax.random.normal(ks[1], (16,), jnp.float32) * 0.10
    w2 = jax.random.normal(ks[2], (32, 16, 3, 3), jnp.float32) * 0.10
    b2 = jax.random.normal(ks[3], (32,), jnp.float32) * 0.10
    w3 = jax.random.normal(ks[4], (64, 32, 3, 3), jnp.float32) * 0.08
    b3 = jax.random.normal(ks[5], (64,), jnp.float32) * 0.10
    wl = jax.random.normal(ks[6], (10, 256), jnp.float32) * 0.06
    bl = jax.random.normal(ks[7], (10,), jnp.float32) * 0.10
    return (w1, b1, w2, b2, w3, b3, wl, bl)


def _lower_conv3x3(w_oihw, hin):
    """Lowered dense matrix W_L of shape (Hin*Hin*Cin, Hout*Hout*Cout) so that
    flatten_hwc(x) @ W_L == flatten_hwc(conv3x3_valid(x)) for NHWC x."""
    o, i, _, _ = w_oihw.shape
    hout = hin - 2
    basis = jnp.eye(hin * hin * i, dtype=jnp.float32).reshape(-1, hin, hin, i)
    y = lax.conv_general_dilated(
        basis, w_oihw, window_strides=(1, 1), padding='VALID',
        dimension_numbers=('NHWC', 'OIHW', 'NHWC'))       # (K, hout, hout, o)
    return y.reshape(hin * hin * i, hout * hout * o)


def to_kernel_params(pt_params):
    """Convert PyTorch-convention params to the lowered / lane-dense layout."""
    (w1, b1, w2, b2, w3, b3, wl, bl) = pt_params

    # Lowered conv matrices (flatten order (h, w, c) on both sides).
    w1l = _lower_conv3x3(w1, 8)      # (64, 576)
    w2l = _lower_conv3x3(w2, 6)      # (576, 512)
    w3l = _lower_conv3x3(w3, 4)      # (512, 256)

    # Biases broadcast over spatial positions in (h, w, c) flatten order.
    b1f = jnp.tile(b1, 36).reshape(1, 576)
    b2f = jnp.tile(b2, 16).reshape(1, 512)
    b3f = jnp.tile(b3, 4).reshape(1, 256)

    # Linear (10, 256=C*H*W) -> rows in (h, w, c) order -> (256, 10), then
    # zero-pad the output dim to 128 lanes (lane-dense output store).
    wlk = jnp.transpose(wl.reshape(10, 64, 2, 2), (2, 3, 1, 0)).reshape(256, 10)
    wlk = jnp.pad(wlk, ((0, 0), (0, 128 - 10)))
    blk = jnp.pad(bl.reshape(1, 10), ((0, 0), (0, 128 - 10)))
    return (w1l, b1f, w2l, b2f, w3l, b3f, wlk, blk)


def ref_forward(x_nchw, pt_params):
    """Plain-JAX reference mirroring the PyTorch module (NCHW throughout)."""
    (w1, b1, w2, b2, w3, b3, wl, bl) = pt_params
    y = x_nchw
    for w, b in ((w1, b1), (w2, b2), (w3, b3)):
        y = lax.conv_general_dilated(
            y, w, window_strides=(1, 1), padding='VALID',
            dimension_numbers=('NCHW', 'OIHW', 'NCHW'))
        y = jnp.maximum(y + b.reshape(1, -1, 1, 1), 0.0)
    flat = y.reshape(y.shape[0], -1)     # NCHW flatten, matches torch.nn.Flatten
    return flat @ wl.T + bl


if __name__ == "__main__":
    key = jax.random.PRNGKey(0)
    k_x, k_p = jax.random.split(key)

    n = 4
    x = jax.random.normal(k_x, (n, 1, 8, 8), jnp.float32)   # [n, 1, 8, 8] as in forward()

    pt_params = init_pt_params(k_p)
    kernel_params = to_kernel_params(pt_params)

    logits = cnn_forward(x, kernel_params)
    logits = jax.block_until_ready(logits)

    ref = ref_forward(x, pt_params)
    assert logits.shape == (n, 10)
    np.testing.assert_allclose(np.asarray(logits), np.asarray(ref),
                               rtol=1e-3, atol=1e-3)
    print("KERNEL_OK")
</pallas_src>

<mosaic_0001>
module attributes {stable_mosaic.version = 11 : i64} {
  func.func @cnn_kernel(%arg0: i32, %arg1: memref<8x64xf32, #tpu.memory_space<vmem>>, %arg2: memref<64x576xf32, #tpu.memory_space<vmem>>, %arg3: memref<1x576xf32, #tpu.memory_space<vmem>>, %arg4: memref<576x512xf32, #tpu.memory_space<vmem>>, %arg5: memref<1x512xf32, #tpu.memory_space<vmem>>, %arg6: memref<512x256xf32, #tpu.memory_space<vmem>>, %arg7: memref<1x256xf32, #tpu.memory_space<vmem>>, %arg8: memref<256x128xf32, #tpu.memory_space<vmem>>, %arg9: memref<1x128xf32, #tpu.memory_space<vmem>>, %arg10: memref<8x128xf32, #tpu.memory_space<vmem>>) attributes {dimension_semantics = [#tpu.dimension_semantics<parallel>], iteration_bounds = array<i64: 1>, scalar_prefetch = 0 : i64, scratch_operands = 0 : i64, tpu.core_type = #tpu.core_type<tc>, window_params = [{transform_indices = @transform_0, window_bounds = array<i64: 8, 64>}, {pipeline_mode = #tpu.pipeline_mode<synchronous>, transform_indices = @transform_1, window_bounds = array<i64: 64, 576>}, {pipeline_mode = #tpu.pipeline_mode<synchronous>, transform_indices = @transform_2, window_bounds = array<i64: 1, 576>}, {pipeline_mode = #tpu.pipeline_mode<synchronous>, transform_indices = @transform_3, window_bounds = array<i64: 576, 512>}, {pipeline_mode = #tpu.pipeline_mode<synchronous>, transform_indices = @transform_4, window_bounds = array<i64: 1, 512>}, {pipeline_mode = #tpu.pipeline_mode<synchronous>, transform_indices = @transform_5, window_bounds = array<i64: 512, 256>}, {pipeline_mode = #tpu.pipeline_mode<synchronous>, transform_indices = @transform_6, window_bounds = array<i64: 1, 256>}, {pipeline_mode = #tpu.pipeline_mode<synchronous>, transform_indices = @transform_7, window_bounds = array<i64: 256, 128>}, {pipeline_mode = #tpu.pipeline_mode<synchronous>, transform_indices = @transform_8, window_bounds = array<i64: 1, 128>}, {transform_indices = @transform_9, window_bounds = array<i64: 8, 128>}]} {
    %c0 = arith.constant 0 : index
    %c0_0 = arith.constant 0 : index
    %0 = vector.load %arg1[%c0, %c0_0] : memref<8x64xf32, #tpu.memory_space<vmem>>, vector<8x64xf32>
    %c0_1 = arith.constant 0 : index
    %c0_2 = arith.constant 0 : index
    %1 = vector.load %arg2[%c0_1, %c0_2] : memref<64x576xf32, #tpu.memory_space<vmem>>, vector<64x576xf32>
    %cst = arith.constant dense<0.000000e+00> : vector<8x576xf32>
    %2 = tpu.matmul %0, %1, %cst {dimension_numbers = #tpu.dot_dimension_numbers<[1], [0], [0], [1], [0, 0, 1, 1], [], []>} : vector<8x64xf32>, vector<64x576xf32>, vector<8x576xf32> -> vector<8x576xf32>
    %c0_3 = arith.constant 0 : index
    %c0_4 = arith.constant 0 : index
    %3 = vector.load %arg3[%c0_3, %c0_4] : memref<1x576xf32, #tpu.memory_space<vmem>>, vector<1x576xf32>
    %4 = vector.broadcast %3 : vector<1x576xf32> to vector<8x576xf32>
    %5 = arith.addf %2, %4 : vector<8x576xf32>
    %cst_5 = arith.constant 0.000000e+00 : f32
    %6 = vector.broadcast %cst_5 : f32 to vector<8x576xf32>
    %7 = arith.maximumf %5, %6 : vector<8x576xf32>
    %c0_6 = arith.constant 0 : index
    %c0_7 = arith.constant 0 : index
    %8 = vector.load %arg4[%c0_6, %c0_7] : memref<576x512xf32, #tpu.memory_space<vmem>>, vector<576x512xf32>
    %cst_8 = arith.constant dense<0.000000e+00> : vector<8x512xf32>
    %9 = tpu.matmul %7, %8, %cst_8 {dimension_numbers = #tpu.dot_dimension_numbers<[1], [0], [0], [1], [0, 0, 1, 1], [], []>} : vector<8x576xf32>, vector<576x512xf32>, vector<8x512xf32> -> vector<8x512xf32>
    %c0_9 = arith.constant 0 : index
    %c0_10 = arith.constant 0 : index
    %10 = vector.load %arg5[%c0_9, %c0_10] : memref<1x512xf32, #tpu.memory_space<vmem>>, vector<1x512xf32>
    %11 = vector.broadcast %10 : vector<1x512xf32> to vector<8x512xf32>
    %12 = arith.addf %9, %11 : vector<8x512xf32>
    %cst_11 = arith.constant 0.000000e+00 : f32
    %13 = vector.broadcast %cst_11 : f32 to vector<8x512xf32>
    %14 = arith.maximumf %12, %13 : vector<8x512xf32>
    %c0_12 = arith.constant 0 : index
    %c0_13 = arith.constant 0 : index
    %15 = vector.load %arg6[%c0_12, %c0_13] : memref<512x256xf32, #tpu.memory_space<vmem>>, vector<512x256xf32>
    %cst_14 = arith.constant dense<0.000000e+00> : vector<8x256xf32>
    %16 = tpu.matmul %14, %15, %cst_14 {dimension_numbers = #tpu.dot_dimension_numbers<[1], [0], [0], [1], [0, 0, 1, 1], [], []>} : vector<8x512xf32>, vector<512x256xf32>, vector<8x256xf32> -> vector<8x256xf32>
    %c0_15 = arith.constant 0 : index
    %c0_16 = arith.constant 0 : index
    %17 = vector.load %arg7[%c0_15, %c0_16] : memref<1x256xf32, #tpu.memory_space<vmem>>, vector<1x256xf32>
    %18 = vector.broadcast %17 : vector<1x256xf32> to vector<8x256xf32>
    %19 = arith.addf %16, %18 : vector<8x256xf32>
    %cst_17 = arith.constant 0.000000e+00 : f32
    %20 = vector.broadcast %cst_17 : f32 to vector<8x256xf32>
    %21 = arith.maximumf %19, %20 : vector<8x256xf32>
    %c0_18 = arith.constant 0 : index
    %c0_19 = arith.constant 0 : index
    %22 = vector.load %arg8[%c0_18, %c0_19] : memref<256x128xf32, #tpu.memory_space<vmem>>, vector<256x128xf32>
    %cst_20 = arith.constant dense<0.000000e+00> : vector<8x128xf32>
    %23 = tpu.matmul %21, %22, %cst_20 {dimension_numbers = #tpu.dot_dimension_numbers<[1], [0], [0], [1], [0, 0, 1, 1], [], []>} : vector<8x256xf32>, vector<256x128xf32>, vector<8x128xf32> -> vector<8x128xf32>
    %c0_21 = arith.constant 0 : index
    %c0_22 = arith.constant 0 : index
    %24 = vector.load %arg9[%c0_21, %c0_22] : memref<1x128xf32, #tpu.memory_space<vmem>>, vector<1x128xf32>
    %25 = vector.broadcast %24 : vector<1x128xf32> to vector<8x128xf32>
    %26 = arith.addf %23, %25 : vector<8x128xf32>
    %c0_23 = arith.constant 0 : index
    %c0_24 = arith.constant 0 : index
    %27 = vector.load %arg10[%c0_23, %c0_24] : memref<8x128xf32, #tpu.memory_space<vmem>>, vector<8x128xf32>
    tpu.vector_store %arg10[%c0_23, %c0_24], %26 {strides = array<i32>} : memref<8x128xf32, #tpu.memory_space<vmem>>, vector<8x128xf32>,
    return
  }
  func.func @transform_0(%arg0: i32) -> (i32, i32) {
    %c0_i32 = arith.constant 0 : i32
    %c0_i32_0 = arith.constant 0 : i32
    return %arg0, %c0_i32 : i32, i32
  }
  func.func @transform_1(%arg0: i32) -> (i32, i32) {
    %c0_i32 = arith.constant 0 : i32
    %c0_i32_0 = arith.constant 0 : i32
    %c0_i32_1 = arith.constant 0 : i32
    return %c0_i32, %c0_i32_0 : i32, i32
  }
  func.func @transform_2(%arg0: i32) -> (i32, i32) {
    %c0_i32 = arith.constant 0 : i32
    %c0_i32_0 = arith.constant 0 : i32
    %c0_i32_1 = arith.constant 0 : i32
    return %c0_i32, %c0_i32_0 : i32, i32
  }
  func.func @transform_3(%arg0: i32) -> (i32, i32) {
    %c0_i32 = arith.constant 0 : i32
    %c0_i32_0 = arith.constant 0 : i32
    %c0_i32_1 = arith.constant 0 : i32
    return %c0_i32, %c0_i32_0 : i32, i32
  }
  func.func @transform_4(%arg0: i32) -> (i32, i32) {
    %c0_i32 = arith.constant 0 : i32
    %c0_i32_0 = arith.constant 0 : i32
    %c0_i32_1 = arith.constant 0 : i32
    return %c0_i32, %c0_i32_0 : i32, i32
  }
  func.func @transform_5(%arg0: i32) -> (i32, i32) {
    %c0_i32 = arith.constant 0 : i32
    %c0_i32_0 = arith.constant 0 : i32
    %c0_i32_1 = arith.constant 0 : i32
    return %c0_i32, %c0_i32_0 : i32, i32
  }
  func.func @transform_6(%arg0: i32) -> (i32, i32) {
    %c0_i32 = arith.constant 0 : i32
    %c0_i32_0 = arith.constant 0 : i32
    %c0_i32_1 = arith.constant 0 : i32
    return %c0_i32, %c0_i32_0 : i32, i32
  }
  func.func @transform_7(%arg0: i32) -> (i32, i32) {
    %c0_i32 = arith.constant 0 : i32
    %c0_i32_0 = arith.constant 0 : i32
    %c0_i32_1 = arith.constant 0 : i32
    return %c0_i32, %c0_i32_0 : i32, i32
  }
  func.func @transform_8(%arg0: i32) -> (i32, i32) {
    %c0_i32 = arith.constant 0 : i32
    %c0_i32_0 = arith.constant 0 : i32
    %c0_i32_1 = arith.constant 0 : i32
    return %c0_i32, %c0_i32_0 : i32, i32
  }
  func.func @transform_9(%arg0: i32) -> (i32, i32) {
    %c0_i32 = arith.constant 0 : i32
    %c0_i32_0 = arith.constant 0 : i32
    return %arg0, %c0_i32 : i32, i32
  }
}

</mosaic_0001>

<bundles_post_ra>
// kernel: tpu_custom_call.1
= control target key start
LH: loop header
LB: loop body
LE: loop exit
PB: predicated region body
PF: predicated region fallthrough
CT: control target
= control target key end

     0   :  { %14 = vsyncpa [#allocation3], 0  ;;  %s1861_s0 = inlined_call_operand.hbm [shape: f32[8,64], index: 0, kind: input, shape index: {}]   ;;  %s1862_s1 = inlined_call_operand.hbm [shape: f32[64,576], index: 1, kind: input, shape index: {}]   ;;  %s1863_s2 = inlined_call_operand.hbm [shape: f32[1,576], index: 2, kind: input, shape index: {}]   ;;  %s1864_s3 = inlined_call_operand.hbm [shape: f32[576,512], index: 3, kind: input, shape index: {}]   ;;  %s1865_s4 = inlined_call_operand.hbm [shape: f32[1,512], index: 4, kind: input, shape index: {}]   ;;  %s1866_s5 = inlined_call_operand.hbm [shape: f32[512,256], index: 5, kind: input, shape index: {}]   ;;  %s1867_s6 = inlined_call_operand.hbm [shape: f32[1,256], index: 6, kind: input, shape index: {}]   ;;  %s1868_s7 = inlined_call_operand.hbm [shape: f32[256,128], index: 7, kind: input, shape index: {}]   ;;  %s1869_s8 = inlined_call_operand.hbm [shape: f32[1,128], index: 8, kind: input, shape index: {}]   ;;  %s1870_s9 = inlined_call_operand.hbm [shape: f32[8,128], index: 9, kind: output, shape index: {}]  }
   0x1   :  { %15 = vsyncpa [#allocation6], 0 }
   0x2   :  { %16 = vsyncpa [#allocation9], 0 }
   0x3   :  { %17 = vsyncpa [#allocation12], 0 }
   0x4   :  { %18 = vsyncpa [#allocation15], 0  ;;  %s35_s11 = sshll.u32 %s1862_s1, 4  ;;  %s36_s11 = int_to_ptr.hbm [resolvable:$true] %s35_s11 }
   0x5   :  { %19 = vsyncpa [#allocation4], 0  ;;  %s1704_s12 = smov [#allocation5]   ;;  %s59_s16 = sshll.u32 %s1864_s3, 4  ;;  %s60_s16 = int_to_ptr.hbm [resolvable:$true] %s59_s16 }
   0x6   :  { %s37_s13 = sshll.u32 %s1704_s12, 4  ;;  %s1705_s17 = smov 640   ;;  %s38_s13 = int_to_ptr.vmem [resolvable:$true] %s37_s13 }
   0x7   :  { %s1706_s18 = smov 40   ;;  %s1707_s19 = smov [#allocation8]  }
   0x8   :  { %43 = dma.hbm_to_vmem [thread:$0]  %s36_s11, 5120, %s38_s13, [#allocation6], %s1705_s17, %s1705_s17, %s1706_s18  }
   0x9   :  { %s61_s20 = sshll.u32 %s1707_s19, 4  ;;  %s1708_s21 = smov 512   ;;  %s62_s20 = int_to_ptr.vmem [resolvable:$true] %s61_s20 }
   0xa   :  { %s1709_s22 = smov 32   ;;  %s83_s24 = sshll.u32 %s1866_s5, 4  ;;  %s84_s24 = int_to_ptr.hbm [resolvable:$true] %s83_s24 }
   0xb   :  { %67 = dma.hbm_to_vmem [thread:$0]  %s60_s16, 36864, %s62_s20, [#allocation9], %s1708_s21, %s1708_s21, %s1709_s22  }
   0xc   :  { %s1710_s25 = smov [#allocation11]   ;;  %s107_s28 = sshll.u32 %s1868_s7, 4  ;;  %s108_s28 = int_to_ptr.hbm [resolvable:$true] %s107_s28 }
   0xd   :  { %s85_s26 = sshll.u32 %s1710_s25, 4  ;;  %s1711_s29 = smov 256   ;;  %s86_s26 = int_to_ptr.vmem [resolvable:$true] %s85_s26 }
   0xe   :  { %s1712_s30 = smov 16   ;;  %s1713_s10 = smov [#allocation14]  }
   0xf   :  { %91 = dma.hbm_to_vmem [thread:$0]  %s84_s24, 16384, %s86_s26, [#allocation12], %s1711_s29, %s1711_s29, %s1712_s30  }
  0x10   :  { %s109_s11 = sshll.u32 %s1713_s10, 4  ;;  %s1714_s12 = smov 128   ;;  %s110_s11 = int_to_ptr.vmem [resolvable:$true] %s109_s11 }
  0x11   :  { %s1715_s13 = smov 8   ;;  %s25_s15 = sshll.u32 %s1861_s0, 4  ;;  %s26_s15 = int_to_ptr.hbm [resolvable:$true] %s25_s15 }
  0x12   :  { %115 = dma.hbm_to_vmem [thread:$0]  %s108_s28, 4096, %s110_s11, [#allocation15], %s1714_s12, %s1714_s12, %s1715_s13  }
  0x13   :  { %s1716_s16 = smov [#allocation2]   ;;  %s49_s19 = sshll.u32 %s1863_s2, 4  ;;  %s50_s19 = int_to_ptr.hbm [resolvable:$true] %s49_s19 }
  0x14   :  { %s27_s17 = sshll.u32 %s1716_s16, 4  ;;  %s1717_s20 = smov [#allocation7]   ;;  %s28_s17 = int_to_ptr.vmem [resolvable:$true] %s27_s17 }
  0x15   :  { %30 = dma.hbm_to_vmem [thread:$0]  %s26_s15, 128, %s28_s17, [#allocation3]  }
  0x16   :  { %s51_s21 = sshll.u32 %s1717_s20, 4  ;;  %s73_s23 = sshll.u32 %s1865_s4, 4  ;;  %s52_s21 = int_to_ptr.vmem [resolvable:$true] %s51_s21  ;;  %s74_s23 = int_to_ptr.hbm [resolvable:$true] %s73_s23 }
  0x17   :  { %54 = dma.hbm_to_vmem [thread:$0]  %s50_s19, 80, %s52_s21, [#allocation6]  }
  0x18   :  { %s97_s25 = sshll.u32 %s1867_s6, 4  ;;  %s1718_s26 = smov [#allocation10]   ;;  %s98_s25 = int_to_ptr.hbm [resolvable:$true] %s97_s25 }
  0x19   :  { %s75_s27 = sshll.u32 %s1718_s26, 4  ;;  %s1719_s2 = smov [#allocation13]   ;;  %s76_s27 = int_to_ptr.vmem [resolvable:$true] %s75_s27 }
  0x1a   :  { %78 = dma.hbm_to_vmem [thread:$0]  %s74_s23, 64, %s76_s27, [#allocation9]  }
  0x1b   :  { %s99_s3 = sshll.u32 %s1719_s2, 4  ;;  %s121_s30 = sshll.u32 %s1869_s8, 4  ;;  %s100_s3 = int_to_ptr.vmem [resolvable:$true] %s99_s3  ;;  %s122_s30 = int_to_ptr.hbm [resolvable:$true] %s121_s30 }
  0x1c   :  { %102 = dma.hbm_to_vmem [thread:$0]  %s98_s25, 32, %s100_s3, [#allocation12]  }
  0x1d   :  { %s1720_s4 = smov [#allocation16]  }
  0x1e   :  { %s123_s10 = sshll.u32 %s1720_s4, 4  ;;  %s124_s10 = int_to_ptr.vmem [resolvable:$true] %s123_s10 }
  0x1f   :  { %126 = dma.hbm_to_vmem [thread:$0]  %s122_s30, 16, %s124_s10, [#allocation15]  }
  0x20   :  { %1692 = dma.done.wait [#allocation3], 128  }
  0x21   :  { %1693 = vsyncadd [#allocation3], 4294967168 }
  0x22   :  { %1694 = dma.done.wait [#allocation6], 5200  }
  0x23   :  { %1695 = vsyncadd [#allocation6], 4294962096 }
  0x24   :  { %1696 = dma.done.wait [#allocation9], 36928  }
  0x25   :  { %1697 = vsyncadd [#allocation9], 4294930368 }
  0x26   :  { %1698 = dma.done.wait [#allocation12], 16416  }
  0x27   :  { %1699 = vsyncadd [#allocation12], 4294950880 }
  0x28   :  { %1700 = dma.done.wait [#allocation15], 4112  }
  0x29   :  { %1701 = vsyncadd [#allocation15], 4294963184  ;;  %v199_v0 = vld [vmem:[#allocation5 + $0x118] sm:$0xff]  ;;  %v200_v1 = vld [vmem:[#allocation5 + $0x120] sm:$0xff]  ;;  %vm216_vm0 = vcmask 523264   ;;  %s1721_s6 = smov [#allocation17]  }
  0x2a   :  { %v201_v2 = vld [vmem:[#allocation5 + $0x128] sm:$0xff]  ;;  %228 = vmatpush.msra.mxu0 %v199_v0  ;;  %248 = vmatpush.msra.mxu3 %v200_v1  ;;  %v194_v3 = vld [vmem:[#allocation5 + $0xf0] sm:$0xff]  ;;  %v195_v4 = vld [vmem:[#allocation5 + $0xf8] sm:$0xff]  ;;  %s1408_s8 = sshll.u32 %s1721_s6, 4  ;;  %s1410_s13 = sshll.u32 %s1870_s9, 4  ;;  %s1409_s8 = int_to_ptr.vmem [resolvable:$true] %s1408_s8  ;;  %s1411_s13 = int_to_ptr.hbm [resolvable:$true] %s1410_s13 }
  0x2b   :  { %v196_v5 = vld [vmem:[#allocation5 + $0x100] sm:$0xff]  ;;  %268 = vmatpush.msra.mxu2 %v201_v2  ;;  %v189_v6 = vld [vmem:[#allocation5 + $0xc8] sm:$0xff]  ;;  %v190_v7 = vld [vmem:[#allocation5 + $0xd0] sm:$0xff] }
  0x2c   :  { %229 = vmatpush.msra.mxu0 %v194_v3  ;;  %249 = vmatpush.msra.mxu3 %v195_v4  ;;  %v191_v8 = vld [vmem:[#allocation5 + $0xd8] sm:$0xff]  ;;  %v184_v9 = vld [vmem:[#allocation5 + $0xa0] sm:$0xff]  ;;  %v185_v10 = vld [vmem:[#allocation5 + $0xa8] sm:$0xff] }
  0x2d   :  { %269 = vmatpush.msra.mxu2 %v196_v5  ;;  %v186_v11 = vld [vmem:[#allocation5 + $0xb0] sm:$0xff]  ;;  %v179_v12 = vld [vmem:[#allocation5 + $0x78] sm:$0xff]  ;;  %v180_v13 = vld [vmem:[#allocation5 + $0x80] sm:$0xff] }
  0x2e   :  { %230 = vmatpush.msra.mxu0 %v189_v6  ;;  %250 = vmatpush.msra.mxu3 %v190_v7  ;;  %v181_v14 = vld [vmem:[#allocation5 + $0x88] sm:$0xff]  ;;  %v174_v15 = vld [vmem:[#allocation5 + $0x50] sm:$0xff]  ;;  %v175_v16 = vld [vmem:[#allocation5 + $0x58] sm:$0xff] }
  0x2f   :  { %270 = vmatpush.msra.mxu2 %v191_v8  ;;  %v176_v17 = vld [vmem:[#allocation5 + $0x60] sm:$0xff]  ;;  %v169_v18 = vld [vmem:[#allocation5 + $0x28] sm:$0xff]  ;;  %v170_v19 = vld [vmem:[#allocation5 + $0x30] sm:$0xff] }
  0x30   :  { %231 = vmatpush.msra.mxu0 %v184_v9  ;;  %251 = vmatpush.msra.mxu3 %v185_v10  ;;  %v171_v20 = vld [vmem:[#allocation5 + $0x38] sm:$0xff]  ;;  %v164_v21 = vld [vmem:[#allocation5] sm:$0xff]  ;;  %v165_v22 = vld [vmem:[#allocation5 + $0x8] sm:$0xff] }
  0x31   :  { %271 = vmatpush.msra.mxu2 %v186_v11  ;;  %v166_v23 = vld [vmem:[#allocation5 + $0x10] sm:$0xff]  ;;  %v1799_v24 = vld [vmem:[#allocation2] sm:$0xff]  ;;  %v449_v27 = vld [vmem:[#allocation8 + $0x3e0] sm:$0xff] }
  0x32   :  { %232 = vmatpush.msra.mxu0 %v179_v12  ;;  %252 = vmatpush.msra.mxu3 %v180_v13  ;;  %v202_v25 = vld [vmem:[#allocation5 + $0x130] sm:$0xff]  ;;  %v203_v26 = vld [vmem:[#allocation5 + $0x138] sm:$0xff]  ;;  %v197_v28 = vld [vmem:[#allocation5 + $0x108] sm:$0xff] }
  0x33   :  { %272 = vmatpush.msra.mxu2 %v181_v14  ;;  %v198_v29 = vld [vmem:[#allocation5 + $0x110] sm:$0xff]  ;;  %v385_v30 = vld [vmem:[#allocation8 + $0x1e0] sm:$0xff]  ;;  %v187_v37 = vld [vmem:[#allocation5 + $0xb8] sm:$0xff] }
  0x34   :  { %233 = vmatpush.msra.mxu0 %v174_v15  ;;  %253 = vmatpush.msra.mxu3 %v175_v16  ;;  %v445_v31 = vld [vmem:[#allocation8 + $0x3c0] sm:$0xff]  ;;  %v182_v41 = vld [vmem:[#allocation5 + $0x90] sm:$0xff]  ;;  %v183_v42 = vld [vmem:[#allocation5 + $0x98] sm:$0xff] }
  0x35   :  { %273 = vmatpush.msra.mxu2 %v176_v17  ;;  %v381_v32 = vld [vmem:[#allocation8 + $0x1c0] sm:$0xff]  ;;  %626 = vmatpush.msra.mxu1 %v385_v30  ;;  %v178_v46 = vld [vmem:[#allocation5 + $0x70] sm:$0xff]  ;;  %v167_v53 = vld [vmem:[#allocation5 + $0x18] sm:$0xff] }
  0x36   :  { %234 = vmatpush.msra.mxu0 %v169_v18  ;;  %254 = vmatpush.msra.mxu3 %v170_v19  ;;  %v192_v33 = vld [vmem:[#allocation5 + $0xe0] sm:$0xff]  ;;  %v193_v34 = vld [vmem:[#allocation5 + $0xe8] sm:$0xff] }
  0x37   :  { %274 = vmatpush.msra.mxu2 %v171_v20  ;;  %v441_v35 = vld [vmem:[#allocation8 + $0x3a0] sm:$0xff]  ;;  %627 = vmatpush.msra.mxu1 %v381_v32  ;;  %v382_v30 = vld [vmem:[#allocation8 + $0x1c8] sm:$0xff] }
  0x38   :  { %235 = vmatpush.msra.mxu0 %v164_v21  ;;  %255 = vmatpush.msra.mxu3 %v165_v22  ;;  %v377_v36 = vld [vmem:[#allocation8 + $0x1a0] sm:$0xff] }
  0x39   :  { %275 = vmatpush.msra.mxu2 %v166_v23  ;;  %1424 = vmatmul.msk.f32.vlgmr.msra.gmra.mxu0 %vm216_vm0, %v1799_v24  ;;  %v188_v38 = vld [vmem:[#allocation5 + $0xc0] sm:$0xff]  ;;  %v177_v45 = vld [vmem:[#allocation5 + $0x68] sm:$0xff] }
  0x3a   :  { %1425 = vmatmul.msk.f32.vlgmr.msra.gmra.mxu3 %vm216_vm0, %v1799_v24  ;;  %1426 = vmatmul.msk.f32.vlgmr.msra.gmra.mxu2 %vm216_vm0, %v1799_v24  ;;  %v437_v39 = vld [vmem:[#allocation8 + $0x380] sm:$0xff] }
  0x3b   :  { %288 = vmatpush.msrb.mxu3 %v202_v25  ;;  %308 = vmatpush.msrb.mxu0 %v203_v26  ;;  %v373_v40 = vld [vmem:[#allocation8 + $0x180] sm:$0xff]  ;;  %v386_v26 = vld [vmem:[#allocation8 + $0x1e8] sm:$0xff] }
  0x3c   :  { %646 = vmatpush.msrb.mxu2 %v449_v27  ;;  %628 = vmatpush.msra.mxu1 %v377_v36  ;;  %v433_v43 = vld [vmem:[#allocation8 + $0x360] sm:$0xff] }
  0x3d   :  { %289 = vmatpush.msrb.mxu3 %v197_v28  ;;  %309 = vmatpush.msrb.mxu0 %v198_v29  ;;  %v369_v44 = vld [vmem:[#allocation8 + $0x160] sm:$0xff] }
  0x3e   :  { %647 = vmatpush.msrb.mxu2 %v445_v31  ;;  %629 = vmatpush.msra.mxu1 %v373_v40  ;;  %v429_v47 = vld [vmem:[#allocation8 + $0x340] sm:$0xff] }
  0x3f   :  { %290 = vmatpush.msrb.mxu3 %v192_v33  ;;  %310 = vmatpush.msrb.mxu0 %v193_v34  ;;  %v365_v48 = vld [vmem:[#allocation8 + $0x140] sm:$0xff]  ;;  %v378_v34 = vld [vmem:[#allocation8 + $0x1a8] sm:$0xff] }
  0x40   :  { %648 = vmatpush.msrb.mxu2 %v441_v35  ;;  %v172_v49 = vld [vmem:[#allocation5 + $0x40] sm:$0xff]  ;;  %v173_v50 = vld [vmem:[#allocation5 + $0x48] sm:$0xff]  ;;  %630 = vmatpush.msra.mxu1 %v369_v44 }
  0x41   :  { %291 = vmatpush.msrb.mxu3 %v187_v37  ;;  %311 = vmatpush.msrb.mxu0 %v188_v38  ;;  %v425_v51 = vld [vmem:[#allocation8 + $0x320] sm:$0xff]  ;;  %v374_v38 = vld [vmem:[#allocation8 + $0x188] sm:$0xff] }
  0x42   :  { %649 = vmatpush.msrb.mxu2 %v437_v39  ;;  %v361_v52 = vld [vmem:[#allocation8 + $0x120] sm:$0xff]  ;;  %631 = vmatpush.msra.mxu1 %v365_v48 }
  0x43   :  { %292 = vmatpush.msrb.mxu3 %v182_v41  ;;  %312 = vmatpush.msrb.mxu0 %v183_v42  ;;  %v168_v54 = vld [vmem:[#allocation5 + $0x20] sm:$0xff]  ;;  %v370_v42 = vld [vmem:[#allocation8 + $0x168] sm:$0xff] }
  0x44   :  { %650 = vmatpush.msrb.mxu2 %v433_v43  ;;  %v513_v55 = vld [vmem:[#allocation8 + $0x5e0] sm:$0xff]  ;;  %632 = vmatpush.msra.mxu1 %v361_v52  ;;  %v450_v52 = vld [vmem:[#allocation8 + $0x3e8] sm:$0xff] }
  0x45   :  { %293 = vmatpush.msrb.mxu3 %v177_v45  ;;  %313 = vmatpush.msrb.mxu0 %v178_v46  ;;  %v421_v56 = vld [vmem:[#allocation8 + $0x300] sm:$0xff]  ;;  %v366_v46 = vld [vmem:[#allocation8 + $0x148] sm:$0xff] }
  0x46   :  { %651 = vmatpush.msrb.mxu2 %v429_v47  ;;  %v577_v57 = vld [vmem:[#allocation8 + $0x7e0] sm:$0xff] }
  0x47   :  { %294 = vmatpush.msrb.mxu3 %v172_v49  ;;  %314 = vmatpush.msrb.mxu0 %v173_v50  ;;  %v357_v58 = vld [vmem:[#allocation8 + $0x100] sm:$0xff]  ;;  %v362_v50 = vld [vmem:[#allocation8 + $0x128] sm:$0xff] }
  0x48   :  { %652 = vmatpush.msrb.mxu2 %v425_v51  ;;  %v509_v59 = vld [vmem:[#allocation8 + $0x5c0] sm:$0xff]  ;;  %633 = vmatpush.msra.mxu1 %v357_v58  ;;  %v510_v58 = vld [vmem:[#allocation8 + $0x5c8] sm:$0xff] }
  0x49   :  { %295 = vmatpush.msrb.mxu3 %v167_v53  ;;  %315 = vmatpush.msrb.mxu0 %v168_v54  ;;  %v417_v60 = vld [vmem:[#allocation8 + $0x2e0] sm:$0xff]  ;;  %v358_v54 = vld [vmem:[#allocation8 + $0x108] sm:$0xff] }
  0x4a   :  { %1427 = vmatmul.msk.f32.vlgmr.msrb.gmra.mxu3 %vm216_vm0, %v1799_v24  ;;  %1428 = vmatmul.msk.f32.vlgmr.msrb.gmra.mxu0 %vm216_vm0, %v1799_v24  ;;  %v573_v61 = vld [vmem:[#allocation8 + $0x7c0] sm:$0xff] }
  0x4b   :  { %666 = vmatpush.msra.mxu3 %v513_v55  ;;  %653 = vmatpush.msrb.mxu2 %v421_v56  ;;  %v353_v62 = vld [vmem:[#allocation8 + $0xe0] sm:$0xff]  ;;  %v514_v55 = vld [vmem:[#allocation8 + $0x5e8] sm:$0xff] }
  0x4c   :  { %v505_v63 = vld [vmem:[#allocation8 + $0x5a0] sm:$0xff]  ;;  %686 = vmatpush.msra.mxu0 %v577_v57  ;;  %634 = vmatpush.msra.mxu1 %v353_v62  ;;  %v446_v56 = vld [vmem:[#allocation8 + $0x3c8] sm:$0xff] }
  0x4d   :  { %v413_v0 = vld [vmem:[#allocation8 + $0x2c0] sm:$0xff]  ;;  %667 = vmatpush.msra.mxu3 %v509_v59  ;;  %654 = vmatpush.msrb.mxu2 %v417_v60  ;;  %v354_v57 = vld [vmem:[#allocation8 + $0xe8] sm:$0xff] }
  0x4e   :  { %v569_v1 = vld [vmem:[#allocation8 + $0x7a0] sm:$0xff]  ;;  %687 = vmatpush.msra.mxu0 %v573_v61  ;;  %v442_v59 = vld [vmem:[#allocation8 + $0x3a8] sm:$0xff] }
  0x4f   :  { %v349_v2 = vld [vmem:[#allocation8 + $0xc0] sm:$0xff]  ;;  %668 = vmatpush.msra.mxu3 %v505_v63  ;;  %655 = vmatpush.msrb.mxu2 %v413_v0  ;;  %v350_v60 = vld [vmem:[#allocation8 + $0xc8] sm:$0xff] }
  0x50   :  { %v501_v3 = vld [vmem:[#allocation8 + $0x580] sm:$0xff]  ;;  %688 = vmatpush.msra.mxu0 %v569_v1  ;;  %635 = vmatpush.msra.mxu1 %v349_v2  ;;  %v506_v61 = vld [vmem:[#allocation8 + $0x5a8] sm:$0xff] }
  0x51   :  { %v409_v4 = vld [vmem:[#allocation8 + $0x2a0] sm:$0xff]  ;;  %669 = vmatpush.msra.mxu3 %v501_v3  ;;  %v438_v62 = vld [vmem:[#allocation8 + $0x388] sm:$0xff] }
  0x52   :  { %v565_v5 = vld [vmem:[#allocation8 + $0x780] sm:$0xff]  ;;  %656 = vmatpush.msrb.mxu2 %v409_v4  ;;  %v434_v63 = vld [vmem:[#allocation8 + $0x368] sm:$0xff] }
  0x53   :  { %v345_v6 = vld [vmem:[#allocation8 + $0xa0] sm:$0xff]  ;;  %689 = vmatpush.msra.mxu0 %v565_v5  ;;  %v430_v0 = vld [vmem:[#allocation8 + $0x348] sm:$0xff] }
  0x54   :  { %v497_v7 = vld [vmem:[#allocation8 + $0x560] sm:$0xff]  ;;  %636 = vmatpush.msra.mxu1 %v345_v6  ;;  %v426_v1 = vld [vmem:[#allocation8 + $0x328] sm:$0xff] }
  0x55   :  { %v405_v8 = vld [vmem:[#allocation8 + $0x280] sm:$0xff]  ;;  %670 = vmatpush.msra.mxu3 %v497_v7  ;;  %v422_v2 = vld [vmem:[#allocation8 + $0x308] sm:$0xff] }
  0x56   :  { %v561_v9 = vld [vmem:[#allocation8 + $0x760] sm:$0xff]  ;;  %657 = vmatpush.msrb.mxu2 %v405_v8  ;;  %v418_v3 = vld [vmem:[#allocation8 + $0x2e8] sm:$0xff] }
  0x57   :  { %v341_v10 = vld [vmem:[#allocation8 + $0x80] sm:$0xff]  ;;  %690 = vmatpush.msra.mxu0 %v561_v9  ;;  %v414_v4 = vld [vmem:[#allocation8 + $0x2c8] sm:$0xff] }
  0x58   :  { %v493_v11 = vld [vmem:[#allocation8 + $0x540] sm:$0xff]  ;;  %637 = vmatpush.msra.mxu1 %v341_v10  ;;  %v346_v6 = vld [vmem:[#allocation8 + $0xa8] sm:$0xff] }
  0x59   :  { %v401_v12 = vld [vmem:[#allocation8 + $0x260] sm:$0xff]  ;;  %671 = vmatpush.msra.mxu3 %v493_v11  ;;  %v410_v7 = vld [vmem:[#allocation8 + $0x2a8] sm:$0xff] }
  0x5a   :  { %v557_v13 = vld [vmem:[#allocation8 + $0x740] sm:$0xff]  ;;  %658 = vmatpush.msrb.mxu2 %v401_v12  ;;  %v502_v8 = vld [vmem:[#allocation8 + $0x588] sm:$0xff] }
  0x5b   :  { %v337_v14 = vld [vmem:[#allocation8 + $0x60] sm:$0xff]  ;;  %691 = vmatpush.msra.mxu0 %v557_v13  ;;  %v342_v10 = vld [vmem:[#allocation8 + $0x88] sm:$0xff] }
  0x5c   :  { %v489_v15 = vld [vmem:[#allocation8 + $0x520] sm:$0xff]  ;;  %638 = vmatpush.msra.mxu1 %v337_v14  ;;  %v406_v11 = vld [vmem:[#allocation8 + $0x288] sm:$0xff] }
  0x5d   :  { %v397_v16 = vld [vmem:[#allocation8 + $0x240] sm:$0xff]  ;;  %672 = vmatpush.msra.mxu3 %v489_v15  ;;  %v498_v12 = vld [vmem:[#allocation8 + $0x568] sm:$0xff] }
  0x5e   :  { %v553_v17 = vld [vmem:[#allocation8 + $0x720] sm:$0xff]  ;;  %659 = vmatpush.msrb.mxu2 %v397_v16  ;;  %v338_v14 = vld [vmem:[#allocation8 + $0x68] sm:$0xff] }
  0x5f   :  { %v333_v18 = vld [vmem:[#allocation8 + $0x40] sm:$0xff]  ;;  %692 = vmatpush.msra.mxu0 %v553_v17  ;;  %v402_v15 = vld [vmem:[#allocation8 + $0x268] sm:$0xff] }
  0x60   :  { %v485_v19 = vld [vmem:[#allocation8 + $0x500] sm:$0xff]  ;;  %639 = vmatpush.msra.mxu1 %v333_v18  ;;  %v494_v16 = vld [vmem:[#allocation8 + $0x548] sm:$0xff] }
  0x61   :  { %v393_v20 = vld [vmem:[#allocation8 + $0x220] sm:$0xff]  ;;  %673 = vmatpush.msra.mxu3 %v485_v19  ;;  %v334_v17 = vld [vmem:[#allocation8 + $0x48] sm:$0xff] }
  0x62   :  { %v549_v21 = vld [vmem:[#allocation8 + $0x700] sm:$0xff]  ;;  %660 = vmatpush.msrb.mxu2 %v393_v20  ;;  %v398_v18 = vld [vmem:[#allocation8 + $0x248] sm:$0xff] }
  0x63   :  { %v329_v22 = vld [vmem:[#allocation8 + $0x20] sm:$0xff]  ;;  %693 = vmatpush.msra.mxu0 %v549_v21  ;;  %v490_v19 = vld [vmem:[#allocation8 + $0x528] sm:$0xff] }
  0x64   :  { %v481_v23 = vld [vmem:[#allocation8 + $0x4e0] sm:$0xff]  ;;  %640 = vmatpush.msra.mxu1 %v329_v22  ;;  %v330_v20 = vld [vmem:[#allocation8 + $0x28] sm:$0xff] }
  0x65   :  { %v389_v24 = vld [vmem:[#allocation8 + $0x200] sm:$0xff]  ;;  %674 = vmatpush.msra.mxu3 %v481_v23  ;;  %v394_v21 = vld [vmem:[#allocation8 + $0x228] sm:$0xff] }
  0x66   :  { %v545_v25 = vld [vmem:[#allocation8 + $0x6e0] sm:$0xff]  ;;  %661 = vmatpush.msrb.mxu2 %v389_v24  ;;  %v486_v22 = vld [vmem:[#allocation8 + $0x508] sm:$0xff] }
  0x67   :  { %v477_v27 = vld [vmem:[#allocation8 + $0x4c0] sm:$0xff]  ;;  %694 = vmatpush.msra.mxu0 %v545_v25  ;;  %v326_v23 = vld [vmem:[#allocation8 + $0x8] sm:$0xff] }
  0x68   :  { %v325_v28 = vld [vmem:[#allocation8] sm:$0xff]  ;;  %726 = vmatpush.msra.mxu2 %v386_v26  ;;  %675 = vmatpush.msra.mxu3 %v477_v27  ;;  %v390_v24 = vld [vmem:[#allocation8 + $0x208] sm:$0xff] }
  0x69   :  { %v541_v29 = vld [vmem:[#allocation8 + $0x6c0] sm:$0xff]  ;;  %641 = vmatpush.msra.mxu1 %v325_v28  ;;  %v482_v25 = vld [vmem:[#allocation8 + $0x4e8] sm:$0xff] }
  0x6a   :  { %v473_v31 = vld [vmem:[#allocation8 + $0x4a0] sm:$0xff]  ;;  %695 = vmatpush.msra.mxu0 %v541_v29  ;;  %727 = vmatpush.msra.mxu2 %v382_v30  ;;  %v478_v26 = vld [vmem:[#allocation8 + $0x4c8] sm:$0xff] }
  0x6b   :  { %v609_v32 = vld [vmem:[#allocation8 + $0x8e0] sm:$0xff]  ;;  %676 = vmatpush.msra.mxu3 %v473_v31  ;;  %v474_v27 = vld [vmem:[#allocation8 + $0x4a8] sm:$0xff] }
  0x6c   :  { %v537_v33 = vld [vmem:[#allocation8 + $0x6a0] sm:$0xff]  ;;  %714 = vmatpush.msrb.mxu1 %v609_v32  ;;  %728 = vmatpush.msra.mxu2 %v378_v34  ;;  %v470_v28 = vld [vmem:[#allocation8 + $0x488] sm:$0xff]  ;;  %v1811_v32 = vld [vmem:[#allocation7] sm:$0x1f] }
  0x6d   :  { %v469_v35 = vld [vmem:[#allocation8 + $0x480] sm:$0xff]  ;;  %696 = vmatpush.msra.mxu0 %v537_v33  ;;  %v466_v29 = vld [vmem:[#allocation8 + $0x468] sm:$0xff]  ;;  %v206_v34 = vperm.slane %v1811_v32, 0 }
  0x6e   :  { %v605_v36 = vld [vmem:[#allocation8 + $0x8c0] sm:$0xff]  ;;  %677 = vmatpush.msra.mxu3 %v469_v35  ;;  %729 = vmatpush.msra.mxu2 %v374_v38  ;;  %v462_v30 = vld [vmem:[#allocation8 + $0x448] sm:$0xff] }
  0x6f   :  { %v533_v37 = vld [vmem:[#allocation8 + $0x680] sm:$0xff]  ;;  %715 = vmatpush.msrb.mxu1 %v605_v36  ;;  %v458_v31 = vld [vmem:[#allocation8 + $0x428] sm:$0xff] }
  0x70   :  { %v465_v39 = vld [vmem:[#allocation8 + $0x460] sm:$0xff]  ;;  %697 = vmatpush.msra.mxu0 %v533_v37  ;;  %730 = vmatpush.msra.mxu2 %v370_v42  ;;  %v454_v33 = vld [vmem:[#allocation8 + $0x408] sm:$0xff] }
  0x71   :  { %v601_v40 = vld [vmem:[#allocation8 + $0x8a0] sm:$0xff]  ;;  %678 = vmatpush.msra.mxu3 %v465_v39  ;;  %v578_v38 = vld [vmem:[#allocation8 + $0x7e8] sm:$0xff]  ;;  %v207_v39 = vperm.slane %v1811_v32, 1 }
  0x72   :  { %v529_v41 = vld [vmem:[#allocation8 + $0x660] sm:$0xff]  ;;  %716 = vmatpush.msrb.mxu1 %v601_v40  ;;  %731 = vmatpush.msra.mxu2 %v366_v46  ;;  %v208_v40 = vperm.slane %v1811_v32, 2 }
  0x73   :  { %v461_v43 = vld [vmem:[#allocation8 + $0x440] sm:$0xff]  ;;  %698 = vmatpush.msra.mxu0 %v529_v41  ;;  %v574_v41 = vld [vmem:[#allocation8 + $0x7c8] sm:$0xff] }
  0x74   :  { %v597_v44 = vld [vmem:[#allocation8 + $0x880] sm:$0xff]  ;;  %679 = vmatpush.msra.mxu3 %v461_v43  ;;  %732 = vmatpush.msra.mxu2 %v362_v50  ;;  %v610_v50 = vld [vmem:[#allocation8 + $0x8e8] sm:$0xff] }
  0x75   :  { %v525_v45 = vld [vmem:[#allocation8 + $0x640] sm:$0xff]  ;;  %717 = vmatpush.msrb.mxu1 %v597_v44  ;;  %v570_v44 = vld [vmem:[#allocation8 + $0x7a8] sm:$0xff] }
  0x76   :  { %v457_v47 = vld [vmem:[#allocation8 + $0x420] sm:$0xff]  ;;  %699 = vmatpush.msra.mxu0 %v525_v45  ;;  %733 = vmatpush.msra.mxu2 %v358_v54  ;;  %v383_v54 = vld [vmem:[#allocation8 + $0x1d0] sm:$0xff] }
  0x77   :  { %v593_v48 = vld [vmem:[#allocation8 + $0x860] sm:$0xff]  ;;  %680 = vmatpush.msra.mxu3 %v457_v47 }
  0x78   :  { %v521_v49 = vld [vmem:[#allocation8 + $0x620] sm:$0xff]  ;;  %718 = vmatpush.msrb.mxu1 %v593_v48  ;;  %734 = vmatpush.msra.mxu2 %v354_v57  ;;  %v379_v57 = vld [vmem:[#allocation8 + $0x1b0] sm:$0xff] }
  0x79   :  { %v453_v51 = vld [vmem:[#allocation8 + $0x400] sm:$0xff]  ;;  %700 = vmatpush.msra.mxu0 %v521_v49  ;;  %v566_v49 = vld [vmem:[#allocation8 + $0x788] sm:$0xff] }
  0x7a   :  { %v517_v53 = vld [vmem:[#allocation8 + $0x600] sm:$0xff]  ;;  %681 = vmatpush.msra.mxu3 %v453_v51  ;;  %735 = vmatpush.msra.mxu2 %v350_v60  ;;  %v387_v51 = vld [vmem:[#allocation8 + $0x1f0] sm:$0xff] }
  0x7b   :  { %701 = vmatpush.msra.mxu0 %v517_v53  ;;  %v589_v5 = vld [vmem:[#allocation8 + $0x840] sm:$0xff]  ;;  %v606_v53 = vld [vmem:[#allocation8 + $0x8c8] sm:$0xff]  ;;  %v375_v60 = vld [vmem:[#allocation8 + $0x190] sm:$0xff] }
  0x7c   :  { %746 = vmatpush.msrb.mxu3 %v450_v52  ;;  %719 = vmatpush.msrb.mxu1 %v589_v5  ;;  %v585_v9 = vld [vmem:[#allocation8 + $0x820] sm:$0xff]  ;;  %v562_v52 = vld [vmem:[#allocation8 + $0x768] sm:$0xff]  ;;  %v367_v5 = vld [vmem:[#allocation8 + $0x150] sm:$0xff] }
  0x7d   :  { %766 = vmatpush.msrb.mxu0 %v514_v55  ;;  %736 = vmatpush.msra.mxu2 %v346_v6  ;;  %v581_v13 = vld [vmem:[#allocation8 + $0x800] sm:$0xff]  ;;  %v558_v55 = vld [vmem:[#allocation8 + $0x748] sm:$0xff] }
  0x7e   :  { %747 = vmatpush.msrb.mxu3 %v446_v56  ;;  %720 = vmatpush.msrb.mxu1 %v585_v9  ;;  %v602_v56 = vld [vmem:[#allocation8 + $0x8a8] sm:$0xff] }
  0x7f   :  { %767 = vmatpush.msrb.mxu0 %v510_v58  ;;  %737 = vmatpush.msra.mxu2 %v342_v10  ;;  %v554_v58 = vld [vmem:[#allocation8 + $0x728] sm:$0xff]  ;;  %v363_v10 = vld [vmem:[#allocation8 + $0x130] sm:$0xff] }
  0x80   :  { %748 = vmatpush.msrb.mxu3 %v442_v59  ;;  %721 = vmatpush.msrb.mxu1 %v581_v13  ;;  %v598_v59 = vld [vmem:[#allocation8 + $0x888] sm:$0xff] }
  0x81   :  { %768 = vmatpush.msrb.mxu0 %v506_v61  ;;  %738 = vmatpush.msra.mxu2 %v338_v14  ;;  %v550_v61 = vld [vmem:[#allocation8 + $0x708] sm:$0xff]  ;;  %v359_v14 = vld [vmem:[#allocation8 + $0x110] sm:$0xff] }
  0x82   :  { %749 = vmatpush.msrb.mxu3 %v438_v62  ;;  %v594_v62 = vld [vmem:[#allocation8 + $0x868] sm:$0xff] }
  0x83   :  { %769 = vmatpush.msrb.mxu0 %v502_v8  ;;  %739 = vmatpush.msra.mxu2 %v334_v17  ;;  %v542_v6 = vld [vmem:[#allocation8 + $0x6c8] sm:$0xff] }
  0x84   :  { %750 = vmatpush.msrb.mxu3 %v434_v63  ;;  %v371_v63 = vld [vmem:[#allocation8 + $0x170] sm:$0xff]  ;;  %v586_v9 = vld [vmem:[#allocation8 + $0x828] sm:$0xff] }
  0x85   :  { %770 = vmatpush.msrb.mxu0 %v498_v12  ;;  %740 = vmatpush.msra.mxu2 %v330_v20  ;;  %v538_v12 = vld [vmem:[#allocation8 + $0x6a8] sm:$0xff]  ;;  %v355_v20 = vld [vmem:[#allocation8 + $0xf0] sm:$0xff] }
  0x86   :  { %751 = vmatpush.msrb.mxu3 %v430_v0  ;;  %v210_v0 = vperm.slane %v1811_v32, 4  ;;  %v582_v13 = vld [vmem:[#allocation8 + $0x808] sm:$0xff] }
  0x87   :  { %771 = vmatpush.msrb.mxu0 %v494_v16  ;;  %741 = vmatpush.msra.mxu2 %v326_v23  ;;  %v579_v16 = vld [vmem:[#allocation8 + $0x7f0] sm:$0xff]  ;;  %v530_v23 = vld [vmem:[#allocation8 + $0x668] sm:$0xff] }
  0x88   :  { %752 = vmatpush.msrb.mxu3 %v426_v1  ;;  %v209_v1 = vperm.slane %v1811_v32, 3  ;;  %v343_v32 = vld [vmem:[#allocation8 + $0x90] sm:$0xff] }
  0x89   :  { %772 = vmatpush.msrb.mxu0 %v490_v19  ;;  %v534_v19 = vld [vmem:[#allocation8 + $0x688] sm:$0xff] }
  0x8a   :  { %753 = vmatpush.msrb.mxu3 %v422_v2  ;;  %v546_v2 = vld [vmem:[#allocation8 + $0x6e8] sm:$0xff] }
  0x8b   :  { %773 = vmatpush.msrb.mxu0 %v486_v22  ;;  %v575_v22 = vld [vmem:[#allocation8 + $0x7d0] sm:$0xff] }
  0x8c   :  { %754 = vmatpush.msrb.mxu3 %v418_v3 }
  0x8d   :  { %774 = vmatpush.msrb.mxu0 %v482_v25  ;;  %v443_v25 = vld [vmem:[#allocation8 + $0x3b0] sm:$0xff] }
  0x8e   :  { %755 = vmatpush.msrb.mxu3 %v414_v4  ;;  %v590_v4 = vld [vmem:[#allocation8 + $0x848] sm:$0xff] }
  0x8f   :  { %775 = vmatpush.msrb.mxu0 %v478_v26  ;;  %v571_v26 = vld [vmem:[#allocation8 + $0x7b0] sm:$0xff] }
  0x90   :  { %756 = vmatpush.msrb.mxu3 %v410_v7 }
  0x91   :  { %776 = vmatpush.msrb.mxu0 %v474_v27  ;;  %v526_v27 = vld [vmem:[#allocation8 + $0x648] sm:$0xff] }
  0x92   :  { %757 = vmatpush.msrb.mxu3 %v406_v11 }
  0x93   :  { %777 = vmatpush.msrb.mxu0 %v470_v28  ;;  %v347_v28 = vld [vmem:[#allocation8 + $0xb0] sm:$0xff] }
  0x94   :  { %758 = vmatpush.msrb.mxu3 %v402_v15 }
  0x95   :  { %778 = vmatpush.msrb.mxu0 %v466_v29  ;;  %v439_v29 = vld [vmem:[#allocation8 + $0x390] sm:$0xff] }
  0x96   :  { %759 = vmatpush.msrb.mxu3 %v398_v18  ;;  %v451_v18 = vld [vmem:[#allocation8 + $0x3f0] sm:$0xff] }
  0x97   :  { %779 = vmatpush.msrb.mxu0 %v462_v30  ;;  %v567_v30 = vld [vmem:[#allocation8 + $0x790] sm:$0xff] }
  0x98   :  { %760 = vmatpush.msrb.mxu3 %v394_v21  ;;  %v447_v21 = vld [vmem:[#allocation8 + $0x3d0] sm:$0xff] }
  0x99   :  { %780 = vmatpush.msrb.mxu0 %v458_v31  ;;  %v522_v31 = vld [vmem:[#allocation8 + $0x628] sm:$0xff] }
  0x9a   :  { %761 = vmatpush.msrb.mxu3 %v390_v24  ;;  %v351_v24 = vld [vmem:[#allocation8 + $0xd0] sm:$0xff] }
  0x9b   :  { %781 = vmatpush.msrb.mxu0 %v454_v33  ;;  %v435_v33 = vld [vmem:[#allocation8 + $0x370] sm:$0xff] }
  0xb6   :  { %v237_v35 = vpop.f32.mrf.mxu0 }
  0xb7   :  { %v238_v36 = vadd.f32 %v237_v35, %v206_v34  ;;  %v563_v34 = vld [vmem:[#allocation8 + $0x770] sm:$0xff]  ;;  %v518_v35 = vld [vmem:[#allocation8 + $0x608] sm:$0xff] }
  0xb9   :  { %v1814_v37 = vmax.f32 %v238_v36, 0.0  ;;  %v339_v36 = vld [vmem:[#allocation8 + $0x70] sm:$0xff] }
  0xbb   :  { %642 = vmatmul.f32.vlgmr.msra.gmra.mxu1 %v1814_v37 }
  0xbc   :  { %786 = vmatpush.msra.mxu1 %v578_v38  ;;  %v431_v38 = vld [vmem:[#allocation8 + $0x350] sm:$0xff] }
  0xbd   :  { %v257_v42 = vpop.f32.mrf.mxu3  ;;  %v277_v43 = vpop.f32.mrf.mxu2 }
  0xbe   :  { %v258_v45 = vadd.f32 %v257_v42, %v207_v39  ;;  %v278_v46 = vadd.f32 %v277_v43, %v208_v40  ;;  %787 = vmatpush.msra.mxu1 %v574_v41  ;;  %v515_v39 = vld [vmem:[#allocation8 + $0x5f0] sm:$0xff] }
  0xbf   :  { %v559_v40 = vld [vmem:[#allocation8 + $0x750] sm:$0xff] }
  0xc0   :  { %v1819_v47 = vmax.f32 %v258_v45, 0.0  ;;  %v1821_v48 = vmax.f32 %v278_v46, 0.0  ;;  %788 = vmatpush.msra.mxu1 %v570_v44  ;;  %v335_v41 = vld [vmem:[#allocation8 + $0x50] sm:$0xff] }
  0xc1   :  { %v427_v42 = vld [vmem:[#allocation8 + $0x330] sm:$0xff] }
  0xc2   :  { %662 = vmatmul.f32.vlgmr.msrb.gmra.mxu2 %v1819_v47  ;;  %682 = vmatmul.f32.vlgmr.msra.gmra.mxu3 %v1821_v48  ;;  %v511_v43 = vld [vmem:[#allocation8 + $0x5d0] sm:$0xff] }
  0xc3   :  { %789 = vmatpush.msra.mxu1 %v566_v49  ;;  %814 = vmatpush.msrb.mxu2 %v610_v50  ;;  %v555_v44 = vld [vmem:[#allocation8 + $0x730] sm:$0xff] }
  0xc4   :  { %826 = vmatpush.msra.mxu3 %v387_v51  ;;  %v331_v45 = vld [vmem:[#allocation8 + $0x30] sm:$0xff] }
  0xc5   :  { %790 = vmatpush.msra.mxu1 %v562_v52  ;;  %815 = vmatpush.msrb.mxu2 %v606_v53  ;;  %v423_v46 = vld [vmem:[#allocation8 + $0x310] sm:$0xff] }
  0xc6   :  { %827 = vmatpush.msra.mxu3 %v383_v54  ;;  %v507_v49 = vld [vmem:[#allocation8 + $0x5b0] sm:$0xff] }
  0xc7   :  { %791 = vmatpush.msra.mxu1 %v558_v55  ;;  %816 = vmatpush.msrb.mxu2 %v602_v56  ;;  %v317_v3 = vpop.f32.mrf.mxu0  ;;  %v551_v50 = vld [vmem:[#allocation8 + $0x710] sm:$0xff] }
  0xc8   :  { %828 = vmatpush.msra.mxu3 %v379_v57  ;;  %v318_v8 = vadd.f32 %v317_v3, %v210_v0  ;;  %v327_v51 = vld [vmem:[#allocation8 + $0x10] sm:$0xff] }
  0xc9   :  { %792 = vmatpush.msra.mxu1 %v554_v58  ;;  %817 = vmatpush.msrb.mxu2 %v598_v59  ;;  %v419_v52 = vld [vmem:[#allocation8 + $0x2f0] sm:$0xff] }
  0xca   :  { %829 = vmatpush.msra.mxu3 %v375_v60  ;;  %742 = vmatmul.f32.vlgmr.msra.gmra.mxu2 %v1814_v37  ;;  %v1831_v17 = vmax.f32 %v318_v8, 0.0  ;;  %v503_v53 = vld [vmem:[#allocation8 + $0x590] sm:$0xff] }
  0xcb   :  { %762 = vmatmul.f32.vlgmr.msrb.gmra.mxu3 %v1819_v47  ;;  %793 = vmatpush.msra.mxu1 %v550_v61  ;;  %v547_v54 = vld [vmem:[#allocation8 + $0x6f0] sm:$0xff] }
  0xcc   :  { %818 = vmatpush.msrb.mxu2 %v594_v62  ;;  %830 = vmatpush.msra.mxu3 %v371_v63  ;;  %v611_v55 = vld [vmem:[#allocation8 + $0x8f0] sm:$0xff] }
  0xcd   :  { %v297_v7 = vpop.f32.mrf.mxu3  ;;  %794 = vmatpush.msra.mxu1 %v546_v2  ;;  %v415_v56 = vld [vmem:[#allocation8 + $0x2d0] sm:$0xff] }
  0xce   :  { %v298_v11 = vadd.f32 %v297_v7, %v209_v1  ;;  %819 = vmatpush.msrb.mxu2 %v590_v4  ;;  %831 = vmatpush.msra.mxu3 %v367_v5  ;;  %v499_v57 = vld [vmem:[#allocation8 + $0x570] sm:$0xff] }
  0xcf   :  { %795 = vmatpush.msra.mxu1 %v542_v6  ;;  %v543_v58 = vld [vmem:[#allocation8 + $0x6d0] sm:$0xff] }
  0xd0   :  { %v1829_v15 = vmax.f32 %v298_v11, 0.0  ;;  %820 = vmatpush.msrb.mxu2 %v586_v9  ;;  %832 = vmatpush.msra.mxu3 %v363_v10  ;;  %v607_v59 = vld [vmem:[#allocation8 + $0x8d0] sm:$0xff] }
  0xd1   :  { %796 = vmatpush.msra.mxu1 %v538_v12  ;;  %v411_v60 = vld [vmem:[#allocation8 + $0x2b0] sm:$0xff] }
  0xd2   :  { %821 = vmatpush.msrb.mxu2 %v582_v13  ;;  %833 = vmatpush.msra.mxu3 %v359_v14  ;;  %v495_v61 = vld [vmem:[#allocation8 + $0x550] sm:$0xff] }
  0xd3   :  { %702 = vmatmul.f32.vlgmr.msra.gmra.mxu0 %v1829_v15  ;;  %797 = vmatpush.msra.mxu1 %v534_v19  ;;  %v539_v62 = vld [vmem:[#allocation8 + $0x6b0] sm:$0xff] }
  0xd4   :  { %886 = vmatpush.msra.mxu2 %v579_v16  ;;  %846 = vmatpush.msra.mxu0 %v451_v18  ;;  %v603_v63 = vld [vmem:[#allocation8 + $0x8b0] sm:$0xff] }
  0xd5   :  { %834 = vmatpush.msra.mxu3 %v355_v20  ;;  %1429 = vmatmul.msk.f32.vlgmr.msrb.gmra.mxu1 %vm216_vm0, %v1831_v17  ;;  %v407_v0 = vld [vmem:[#allocation8 + $0x290] sm:$0xff] }
  0xd6   :  { %847 = vmatpush.msra.mxu0 %v447_v21  ;;  %887 = vmatpush.msra.mxu2 %v575_v22  ;;  %v491_v1 = vld [vmem:[#allocation8 + $0x530] sm:$0xff]  ;;  %v388_v22 = vld [vmem:[#allocation8 + $0x1f8] sm:$0xff] }
  0xd7   :  { %798 = vmatpush.msra.mxu1 %v530_v23  ;;  %835 = vmatpush.msra.mxu3 %v351_v24  ;;  %v535_v2 = vld [vmem:[#allocation8 + $0x690] sm:$0xff]  ;;  %v516_v23 = vld [vmem:[#allocation8 + $0x5f8] sm:$0xff] }
  0xd8   :  { %848 = vmatpush.msra.mxu0 %v443_v25  ;;  %888 = vmatpush.msra.mxu2 %v571_v26  ;;  %v599_v3 = vld [vmem:[#allocation8 + $0x890] sm:$0xff]  ;;  %v580_v24 = vld [vmem:[#allocation8 + $0x7f8] sm:$0xff] }
  0xd9   :  { %799 = vmatpush.msra.mxu1 %v526_v27  ;;  %836 = vmatpush.msra.mxu3 %v347_v28  ;;  %v403_v4 = vld [vmem:[#allocation8 + $0x270] sm:$0xff]  ;;  %v384_v26 = vld [vmem:[#allocation8 + $0x1d8] sm:$0xff] }
  0xda   :  { %1430 = vmatmul.msk.f32.vlgmr.msrb.gmra.mxu2 %vm216_vm0, %v1831_v17  ;;  %849 = vmatpush.msra.mxu0 %v439_v29  ;;  %v487_v5 = vld [vmem:[#allocation8 + $0x510] sm:$0xff]  ;;  %v512_v27 = vld [vmem:[#allocation8 + $0x5d8] sm:$0xff] }
  0xdb   :  { %889 = vmatpush.msra.mxu2 %v567_v30  ;;  %800 = vmatpush.msra.mxu1 %v522_v31  ;;  %v531_v6 = vld [vmem:[#allocation8 + $0x670] sm:$0xff]  ;;  %v576_v28 = vld [vmem:[#allocation8 + $0x7d8] sm:$0xff] }
  0xdc   :  { %837 = vmatpush.msra.mxu3 %v343_v32  ;;  %782 = vmatmul.f32.vlgmr.msrb.gmra.mxu0 %v1821_v48  ;;  %v595_v7 = vld [vmem:[#allocation8 + $0x870] sm:$0xff]  ;;  %v380_v30 = vld [vmem:[#allocation8 + $0x1b8] sm:$0xff] }
  0xdd   :  { %850 = vmatpush.msra.mxu0 %v435_v33  ;;  %890 = vmatpush.msra.mxu2 %v563_v34  ;;  %v399_v8 = vld [vmem:[#allocation8 + $0x250] sm:$0xff]  ;;  %v508_v31 = vld [vmem:[#allocation8 + $0x5b8] sm:$0xff] }
  0xde   :  { %801 = vmatpush.msra.mxu1 %v518_v35  ;;  %838 = vmatpush.msra.mxu3 %v339_v36  ;;  %v483_v9 = vld [vmem:[#allocation8 + $0x4f0] sm:$0xff]  ;;  %v572_v32 = vld [vmem:[#allocation8 + $0x7b8] sm:$0xff] }
  0xdf   :  { %802 = vmatmul.f32.vlgmr.msra.gmra.mxu1 %v1829_v15  ;;  %851 = vmatpush.msra.mxu0 %v431_v38  ;;  %v527_v10 = vld [vmem:[#allocation8 + $0x650] sm:$0xff]  ;;  %v376_v34 = vld [vmem:[#allocation8 + $0x198] sm:$0xff] }
  0xe0   :  { %866 = vmatpush.msrb.mxu1 %v515_v39  ;;  %891 = vmatpush.msra.mxu2 %v559_v40  ;;  %v591_v11 = vld [vmem:[#allocation8 + $0x850] sm:$0xff]  ;;  %v504_v35 = vld [vmem:[#allocation8 + $0x598] sm:$0xff] }
  0xe1   :  { %839 = vmatpush.msra.mxu3 %v335_v41  ;;  %852 = vmatpush.msra.mxu0 %v427_v42  ;;  %v395_v12 = vld [vmem:[#allocation8 + $0x230] sm:$0xff]  ;;  %v568_v36 = vld [vmem:[#allocation8 + $0x798] sm:$0xff] }
  0xe2   :  { %867 = vmatpush.msrb.mxu1 %v511_v43  ;;  %892 = vmatpush.msra.mxu2 %v555_v44  ;;  %v479_v13 = vld [vmem:[#allocation8 + $0x4d0] sm:$0xff]  ;;  %v372_v39 = vld [vmem:[#allocation8 + $0x178] sm:$0xff] }
  0xe3   :  { %840 = vmatpush.msra.mxu3 %v331_v45  ;;  %853 = vmatpush.msra.mxu0 %v423_v46  ;;  %v523_v14 = vld [vmem:[#allocation8 + $0x630] sm:$0xff]  ;;  %v500_v40 = vld [vmem:[#allocation8 + $0x578] sm:$0xff] }
  0xe4   :  { %868 = vmatpush.msrb.mxu1 %v507_v49  ;;  %893 = vmatpush.msra.mxu2 %v551_v50  ;;  %v587_v16 = vld [vmem:[#allocation8 + $0x830] sm:$0xff]  ;;  %v564_v41 = vld [vmem:[#allocation8 + $0x778] sm:$0xff] }
  0xe5   :  { %841 = vmatpush.msra.mxu3 %v327_v51  ;;  %854 = vmatpush.msra.mxu0 %v419_v52  ;;  %v391_v18 = vld [vmem:[#allocation8 + $0x210] sm:$0xff]  ;;  %v368_v43 = vld [vmem:[#allocation8 + $0x158] sm:$0xff] }
  0xe6   :  { %842 = vmatmul.f32.vlgmr.msra.gmra.mxu3 %v1814_v37  ;;  %869 = vmatpush.msrb.mxu1 %v503_v53  ;;  %v475_v19 = vld [vmem:[#allocation8 + $0x4b0] sm:$0xff]  ;;  %v496_v44 = vld [vmem:[#allocation8 + $0x558] sm:$0xff] }
  0xe7   :  { %894 = vmatpush.msra.mxu2 %v547_v54  ;;  %914 = vmatpush.msrb.mxu3 %v611_v55  ;;  %v519_v20 = vld [vmem:[#allocation8 + $0x610] sm:$0xff]  ;;  %v452_v45 = vld [vmem:[#allocation8 + $0x3f8] sm:$0xff] }
  0xe8   :  { %855 = vmatpush.msra.mxu0 %v415_v56  ;;  %870 = vmatpush.msrb.mxu1 %v499_v57  ;;  %v583_v21 = vld [vmem:[#allocation8 + $0x810] sm:$0xff]  ;;  %v560_v46 = vld [vmem:[#allocation8 + $0x758] sm:$0xff] }
  0xe9   :  { %895 = vmatpush.msra.mxu2 %v543_v58  ;;  %915 = vmatpush.msrb.mxu3 %v607_v59  ;;  %v471_v25 = vld [vmem:[#allocation8 + $0x490] sm:$0xff]  ;;  %v364_v49 = vld [vmem:[#allocation8 + $0x138] sm:$0xff] }
  0xea   :  { %856 = vmatpush.msra.mxu0 %v411_v60  ;;  %871 = vmatpush.msrb.mxu1 %v495_v61  ;;  %v467_v29 = vld [vmem:[#allocation8 + $0x470] sm:$0xff]  ;;  %v492_v50 = vld [vmem:[#allocation8 + $0x538] sm:$0xff] }
  0xeb   :  { %896 = vmatpush.msra.mxu2 %v539_v62  ;;  %916 = vmatpush.msrb.mxu3 %v603_v63  ;;  %v463_v33 = vld [vmem:[#allocation8 + $0x450] sm:$0xff]  ;;  %v448_v51 = vld [vmem:[#allocation8 + $0x3d8] sm:$0xff] }
  0xec   :  { %857 = vmatpush.msra.mxu0 %v407_v0  ;;  %872 = vmatpush.msrb.mxu1 %v491_v1  ;;  %v459_v38 = vld [vmem:[#allocation8 + $0x430] sm:$0xff]  ;;  %v556_v52 = vld [vmem:[#allocation8 + $0x738] sm:$0xff] }
  0xed   :  { %897 = vmatpush.msra.mxu2 %v535_v2  ;;  %917 = vmatpush.msrb.mxu3 %v599_v3  ;;  %v455_v42 = vld [vmem:[#allocation8 + $0x410] sm:$0xff]  ;;  %v360_v53 = vld [vmem:[#allocation8 + $0x118] sm:$0xff] }
  0xee   :  { %858 = vmatpush.msra.mxu0 %v403_v4  ;;  %873 = vmatpush.msrb.mxu1 %v487_v5  ;;  %v488_v54 = vld [vmem:[#allocation8 + $0x518] sm:$0xff] }
  0xef   :  { %898 = vmatpush.msra.mxu2 %v531_v6  ;;  %918 = vmatpush.msrb.mxu3 %v595_v7  ;;  %v444_v55 = vld [vmem:[#allocation8 + $0x3b8] sm:$0xff] }
  0xf0   :  { %859 = vmatpush.msra.mxu0 %v399_v8  ;;  %874 = vmatpush.msrb.mxu1 %v483_v9  ;;  %v552_v56 = vld [vmem:[#allocation8 + $0x718] sm:$0xff] }
  0xf1   :  { %899 = vmatpush.msra.mxu2 %v527_v10  ;;  %919 = vmatpush.msrb.mxu3 %v591_v11  ;;  %v356_v57 = vld [vmem:[#allocation8 + $0xf8] sm:$0xff] }
  0xf2   :  { %860 = vmatpush.msra.mxu0 %v395_v12  ;;  %875 = vmatpush.msrb.mxu1 %v479_v13  ;;  %v484_v58 = vld [vmem:[#allocation8 + $0x4f8] sm:$0xff] }
  0xf3   :  { %900 = vmatpush.msra.mxu2 %v523_v14  ;;  %920 = vmatpush.msrb.mxu3 %v587_v16  ;;  %v440_v59 = vld [vmem:[#allocation8 + $0x398] sm:$0xff] }
  0xf4   :  { %861 = vmatpush.msra.mxu0 %v391_v18  ;;  %876 = vmatpush.msrb.mxu1 %v475_v19  ;;  %v548_v60 = vld [vmem:[#allocation8 + $0x6f8] sm:$0xff] }
  0xf5   :  { %901 = vmatpush.msra.mxu2 %v519_v20  ;;  %921 = vmatpush.msrb.mxu3 %v583_v21  ;;  %v352_v61 = vld [vmem:[#allocation8 + $0xd8] sm:$0xff] }
  0xf6   :  { %862 = vmatmul.f32.vlgmr.msra.gmra.mxu0 %v1819_v47  ;;  %902 = vmatmul.f32.vlgmr.msra.gmra.mxu2 %v1829_v15  ;;  %v480_v62 = vld [vmem:[#allocation8 + $0x4d8] sm:$0xff] }
  0xf7   :  { %1431 = vmatmul.msk.f32.vlgmr.msrb.gmra.mxu3 %vm216_vm0, %v1831_v17  ;;  %926 = vmatpush.msrb.mxu0 %v388_v22  ;;  %v436_v63 = vld [vmem:[#allocation8 + $0x378] sm:$0xff] }
  0xf8   :  { %966 = vmatpush.msrb.mxu2 %v516_v23  ;;  %986 = vmatpush.msra.mxu3 %v580_v24  ;;  %v544_v0 = vld [vmem:[#allocation8 + $0x6d8] sm:$0xff] }
  0xf9   :  { %877 = vmatpush.msrb.mxu1 %v471_v25  ;;  %927 = vmatpush.msrb.mxu0 %v384_v26  ;;  %v348_v1 = vld [vmem:[#allocation8 + $0xb8] sm:$0xff] }
  0xfa   :  { %967 = vmatpush.msrb.mxu2 %v512_v27  ;;  %987 = vmatpush.msra.mxu3 %v576_v28  ;;  %v476_v2 = vld [vmem:[#allocation8 + $0x4b8] sm:$0xff] }
  0xfb   :  { %878 = vmatpush.msrb.mxu1 %v467_v29  ;;  %928 = vmatpush.msrb.mxu0 %v380_v30  ;;  %v432_v3 = vld [vmem:[#allocation8 + $0x358] sm:$0xff] }
  0xfc   :  { %968 = vmatpush.msrb.mxu2 %v508_v31  ;;  %988 = vmatpush.msra.mxu3 %v572_v32  ;;  %v540_v4 = vld [vmem:[#allocation8 + $0x6b8] sm:$0xff]  ;;  %v1090_v32 = vld [vmem:[#allocation11 + $0x1e0] sm:$0xff] }
  0xfd   :  { %879 = vmatpush.msrb.mxu1 %v463_v33  ;;  %929 = vmatpush.msrb.mxu0 %v376_v34  ;;  %v344_v5 = vld [vmem:[#allocation8 + $0x98] sm:$0xff] }
  0xfe   :  { %969 = vmatpush.msrb.mxu2 %v504_v35  ;;  %989 = vmatpush.msra.mxu3 %v568_v36  ;;  %v472_v6 = vld [vmem:[#allocation8 + $0x498] sm:$0xff] }
  0xff   :  { %880 = vmatpush.msrb.mxu1 %v459_v38  ;;  %930 = vmatpush.msrb.mxu0 %v372_v39  ;;  %v428_v7 = vld [vmem:[#allocation8 + $0x338] sm:$0xff] }
 0x100   :  { %970 = vmatpush.msrb.mxu2 %v500_v40  ;;  %990 = vmatpush.msra.mxu3 %v564_v41  ;;  %v536_v8 = vld [vmem:[#allocation8 + $0x698] sm:$0xff] }
 0x101   :  { %881 = vmatpush.msrb.mxu1 %v455_v42  ;;  %931 = vmatpush.msrb.mxu0 %v368_v43  ;;  %v340_v9 = vld [vmem:[#allocation8 + $0x78] sm:$0xff]  ;;  %v1082_v42 = vld [vmem:[#allocation11 + $0x1a0] sm:$0xff] }
 0x102   :  { %882 = vmatmul.f32.vlgmr.msrb.gmra.mxu1 %v1821_v48  ;;  %971 = vmatpush.msrb.mxu2 %v496_v44  ;;  %v468_v10 = vld [vmem:[#allocation8 + $0x478] sm:$0xff]  ;;  %v1058_v44 = vld [vmem:[#allocation11 + $0xe0] sm:$0xff] }
 0x103   :  { %946 = vmatpush.msra.mxu1 %v452_v45  ;;  %991 = vmatpush.msra.mxu3 %v560_v46  ;;  %v424_v11 = vld [vmem:[#allocation8 + $0x318] sm:$0xff] }
 0x104   :  { %932 = vmatpush.msrb.mxu0 %v364_v49  ;;  %972 = vmatpush.msrb.mxu2 %v492_v50  ;;  %v532_v12 = vld [vmem:[#allocation8 + $0x678] sm:$0xff]  ;;  %v1078_v50 = vld [vmem:[#allocation11 + $0x180] sm:$0xff] }
 0x105   :  { %947 = vmatpush.msra.mxu1 %v448_v51  ;;  %992 = vmatpush.msra.mxu3 %v556_v52  ;;  %v336_v13 = vld [vmem:[#allocation8 + $0x58] sm:$0xff]  ;;  %v1054_v51 = vld [vmem:[#allocation11 + $0xc0] sm:$0xff] }
 0x106   :  { %933 = vmatpush.msrb.mxu0 %v360_v53  ;;  %973 = vmatpush.msrb.mxu2 %v488_v54  ;;  %v464_v14 = vld [vmem:[#allocation8 + $0x458] sm:$0xff]  ;;  %v1050_v54 = vld [vmem:[#allocation11 + $0xa0] sm:$0xff] }
 0x107   :  { %948 = vmatpush.msra.mxu1 %v444_v55  ;;  %993 = vmatpush.msra.mxu3 %v552_v56  ;;  %v420_v16 = vld [vmem:[#allocation8 + $0x2f8] sm:$0xff] }
 0x108   :  { %934 = vmatpush.msrb.mxu0 %v356_v57  ;;  %974 = vmatpush.msrb.mxu2 %v484_v58  ;;  %v528_v18 = vld [vmem:[#allocation8 + $0x658] sm:$0xff]  ;;  %v1070_v58 = vld [vmem:[#allocation11 + $0x140] sm:$0xff] }
 0x109   :  { %949 = vmatpush.msra.mxu1 %v440_v59  ;;  %994 = vmatpush.msra.mxu3 %v548_v60  ;;  %v332_v19 = vld [vmem:[#allocation8 + $0x38] sm:$0xff]  ;;  %v1046_v59 = vld [vmem:[#allocation11 + $0x80] sm:$0xff] }
 0x10a   :  { %935 = vmatpush.msrb.mxu0 %v352_v61  ;;  %975 = vmatpush.msrb.mxu2 %v480_v62  ;;  %v460_v20 = vld [vmem:[#allocation8 + $0x438] sm:$0xff]  ;;  %v1122_v60 = vld [vmem:[#allocation11 + $0x2e0] sm:$0xff] }
 0x10b   :  { %950 = vmatpush.msra.mxu1 %v436_v63  ;;  %995 = vmatpush.msra.mxu3 %v544_v0  ;;  %v416_v21 = vld [vmem:[#allocation8 + $0x2d8] sm:$0xff]  ;;  %v1066_v63 = vld [vmem:[#allocation11 + $0x120] sm:$0xff] }
 0x10c   :  { %936 = vmatpush.msrb.mxu0 %v348_v1  ;;  %976 = vmatpush.msrb.mxu2 %v476_v2  ;;  %v524_v22 = vld [vmem:[#allocation8 + $0x638] sm:$0xff]  ;;  %v1042_v0 = vld [vmem:[#allocation11 + $0x60] sm:$0xff] }
 0x10d   :  { %951 = vmatpush.msra.mxu1 %v432_v3  ;;  %996 = vmatpush.msra.mxu3 %v540_v4  ;;  %v328_v23 = vld [vmem:[#allocation8 + $0x18] sm:$0xff]  ;;  %v1118_v3 = vld [vmem:[#allocation11 + $0x2c0] sm:$0xff] }
 0x10e   :  { %937 = vmatpush.msrb.mxu0 %v344_v5  ;;  %977 = vmatpush.msrb.mxu2 %v472_v6  ;;  %v456_v24 = vld [vmem:[#allocation8 + $0x418] sm:$0xff]  ;;  %v1062_v4 = vld [vmem:[#allocation11 + $0x100] sm:$0xff] }
 0x10f   :  { %952 = vmatpush.msra.mxu1 %v428_v7  ;;  %997 = vmatpush.msra.mxu3 %v536_v8  ;;  %v412_v25 = vld [vmem:[#allocation8 + $0x2b8] sm:$0xff]  ;;  %v1038_v6 = vld [vmem:[#allocation11 + $0x40] sm:$0xff] }
 0x110   :  { %938 = vmatpush.msrb.mxu0 %v340_v9  ;;  %978 = vmatpush.msrb.mxu2 %v468_v10  ;;  %v520_v26 = vld [vmem:[#allocation8 + $0x618] sm:$0xff]  ;;  %v1114_v8 = vld [vmem:[#allocation11 + $0x2a0] sm:$0xff]  ;;  %v1091_v10 = vld [vmem:[#allocation11 + $0x1e8] sm:$0xff] }
 0x111   :  { %953 = vmatpush.msra.mxu1 %v424_v11  ;;  %998 = vmatpush.msra.mxu3 %v532_v12  ;;  %v612_v27 = vld [vmem:[#allocation8 + $0x8f8] sm:$0xff]  ;;  %v1034_v12 = vld [vmem:[#allocation11 + $0x20] sm:$0xff] }
 0x112   :  { %939 = vmatpush.msrb.mxu0 %v336_v13  ;;  %979 = vmatpush.msrb.mxu2 %v464_v14  ;;  %v408_v28 = vld [vmem:[#allocation8 + $0x298] sm:$0xff] }
 0x113   :  { %954 = vmatpush.msra.mxu1 %v420_v16  ;;  %999 = vmatpush.msra.mxu3 %v528_v18  ;;  %v1092_v29 = vld [vmem:[#allocation11 + $0x1f0] sm:$0xff]  ;;  %v1093_v7 = vld [vmem:[#allocation11 + $0x1f8] sm:$0xff]  ;;  %v1087_v16 = vld [vmem:[#allocation11 + $0x1c8] sm:$0xff] }
 0x114   :  { %940 = vmatpush.msrb.mxu0 %v332_v19  ;;  %980 = vmatpush.msrb.mxu2 %v460_v20  ;;  %v608_v30 = vld [vmem:[#allocation8 + $0x8d8] sm:$0xff]  ;;  %v1110_v18 = vld [vmem:[#allocation11 + $0x280] sm:$0xff] }
 0x115   :  { %955 = vmatpush.msra.mxu1 %v416_v21  ;;  %1000 = vmatpush.msra.mxu3 %v524_v22  ;;  %v404_v31 = vld [vmem:[#allocation8 + $0x278] sm:$0xff]  ;;  %v1030_v19 = vld [vmem:[#allocation11] sm:$0xff]  ;;  %v1083_v22 = vld [vmem:[#allocation11 + $0x1a8] sm:$0xff] }
 0x116   :  { %941 = vmatpush.msrb.mxu0 %v328_v23  ;;  %981 = vmatpush.msrb.mxu2 %v456_v24  ;;  %v604_v33 = vld [vmem:[#allocation8 + $0x8b8] sm:$0xff]  ;;  %v1852_v24 = vld [vmem:[#allocation10] sm:$0xf] }
 0x117   :  { %956 = vmatpush.msra.mxu1 %v412_v25  ;;  %1001 = vmatpush.msra.mxu3 %v520_v26  ;;  %v400_v34 = vld [vmem:[#allocation8 + $0x258] sm:$0xff]  ;;  %v1059_v25 = vld [vmem:[#allocation11 + $0xe8] sm:$0xff]  ;;  %v1106_v26 = vld [vmem:[#allocation11 + $0x260] sm:$0xff] }
 0x118   :  { %942 = vmatmul.f32.vlgmr.msrb.gmra.mxu0 %v1814_v37  ;;  %982 = vmatmul.f32.vlgmr.msrb.gmra.mxu2 %v1821_v48  ;;  %v1088_v35 = vld [vmem:[#allocation11 + $0x1d0] sm:$0xff]  ;;  %v1086_v37 = vld [vmem:[#allocation11 + $0x1c0] sm:$0xff]  ;;  %v1089_v13 = vld [vmem:[#allocation11 + $0x1d8] sm:$0xff] }
 0x119   :  { %1002 = vmatmul.f32.vlgmr.msra.gmra.mxu3 %v1829_v15  ;;  %1014 = vmatpush.msra.mxu0 %v612_v27  ;;  %v600_v36 = vld [vmem:[#allocation8 + $0x898] sm:$0xff] }
 0x11a   :  { %957 = vmatpush.msra.mxu1 %v408_v28  ;;  %1184 = vmatpush.msra.mxu2 %v1092_v29  ;;  %v396_v38 = vld [vmem:[#allocation8 + $0x238] sm:$0xff] }
 0x11b   :  { %1015 = vmatpush.msra.mxu0 %v608_v30  ;;  %v596_v48 = vld [vmem:[#allocation8 + $0x878] sm:$0xff]  ;;  %v615_v30 = vperm.slane %v1852_v24, 0 }
 0x11c   :  { %958 = vmatpush.msra.mxu1 %v404_v31  ;;  %1185 = vmatpush.msra.mxu2 %v1090_v32  ;;  %v392_v15 = vld [vmem:[#allocation8 + $0x218] sm:$0xff]  ;;  %v1079_v31 = vld [vmem:[#allocation11 + $0x188] sm:$0xff] }
 0x11d   :  { %1016 = vmatpush.msra.mxu0 %v604_v33  ;;  %v1084_v39 = vld [vmem:[#allocation11 + $0x1b0] sm:$0xff]  ;;  %v1085_v20 = vld [vmem:[#allocation11 + $0x1b8] sm:$0xff]  ;;  %v1055_v33 = vld [vmem:[#allocation11 + $0xc8] sm:$0xff] }
 0x11e   :  { %959 = vmatpush.msra.mxu1 %v400_v34  ;;  %1186 = vmatpush.msra.mxu2 %v1088_v35  ;;  %v592_v40 = vld [vmem:[#allocation8 + $0x858] sm:$0xff]  ;;  %v1102_v34 = vld [vmem:[#allocation11 + $0x240] sm:$0xff] }
 0x11f   :  { %1017 = vmatpush.msra.mxu0 %v600_v36  ;;  %v1060_v41 = vld [vmem:[#allocation11 + $0xf0] sm:$0xff]  ;;  %v1061_v21 = vld [vmem:[#allocation11 + $0xf8] sm:$0xff] }
 0x120   :  { %960 = vmatpush.msra.mxu1 %v396_v38  ;;  %1187 = vmatpush.msra.mxu2 %v1086_v37  ;;  %v588_v43 = vld [vmem:[#allocation8 + $0x838] sm:$0xff] }
 0x121   :  { %1018 = vmatpush.msra.mxu0 %v596_v48  ;;  %v1080_v45 = vld [vmem:[#allocation11 + $0x190] sm:$0xff]  ;;  %v1081_v27 = vld [vmem:[#allocation11 + $0x198] sm:$0xff] }
 0x122   :  { %961 = vmatpush.msra.mxu1 %v392_v15  ;;  %1188 = vmatpush.msra.mxu2 %v1084_v39  ;;  %v584_v46 = vld [vmem:[#allocation8 + $0x818] sm:$0xff]  ;;  %v1075_v15 = vld [vmem:[#allocation11 + $0x168] sm:$0xff] }
 0x123   :  { %962 = vmatmul.f32.vlgmr.msra.gmra.mxu1 %v1819_v47  ;;  %1019 = vmatpush.msra.mxu0 %v592_v40  ;;  %v1056_v49 = vld [vmem:[#allocation11 + $0xd0] sm:$0xff]  ;;  %v1074_v47 = vld [vmem:[#allocation11 + $0x160] sm:$0xff]  ;;  %v1057_v28 = vld [vmem:[#allocation11 + $0xd8] sm:$0xff] }
 0x124   :  { %1164 = vmatpush.msrb.mxu1 %v1060_v41  ;;  %1189 = vmatpush.msra.mxu2 %v1082_v42  ;;  %v1076_v52 = vld [vmem:[#allocation11 + $0x170] sm:$0xff]  ;;  %v1077_v36 = vld [vmem:[#allocation11 + $0x178] sm:$0xff]  ;;  %v1051_v39 = vld [vmem:[#allocation11 + $0xa8] sm:$0xff] }
 0x125   :  { %1020 = vmatpush.msra.mxu0 %v588_v43  ;;  %v1052_v53 = vld [vmem:[#allocation11 + $0xb0] sm:$0xff]  ;;  %v1053_v38 = vld [vmem:[#allocation11 + $0xb8] sm:$0xff]  ;;  %v1098_v40 = vld [vmem:[#allocation11 + $0x220] sm:$0xff] }
 0x126   :  { %1165 = vmatpush.msrb.mxu1 %v1058_v44  ;;  %1190 = vmatpush.msra.mxu2 %v1080_v45  ;;  %v1072_v55 = vld [vmem:[#allocation11 + $0x150] sm:$0xff]  ;;  %v1073_v42 = vld [vmem:[#allocation11 + $0x158] sm:$0xff] }
 0x127   :  { %1021 = vmatpush.msra.mxu0 %v584_v46  ;;  %v1048_v56 = vld [vmem:[#allocation11 + $0x90] sm:$0xff]  ;;  %v1049_v43 = vld [vmem:[#allocation11 + $0x98] sm:$0xff] }
 0x128   :  { %1432 = vmatmul.msk.f32.vlgmr.msra.gmra.mxu0 %vm216_vm0, %v1831_v17  ;;  %1166 = vmatpush.msrb.mxu1 %v1056_v49  ;;  %v1124_v57 = vld [vmem:[#allocation11 + $0x2f0] sm:$0xff]  ;;  %v1071_v49 = vld [vmem:[#allocation11 + $0x148] sm:$0xff] }
 0x129   :  { %1191 = vmatpush.msra.mxu2 %v1078_v50  ;;  %1204 = vmatpush.msrb.mxu3 %v1124_v57  ;;  %v1068_v17 = vld [vmem:[#allocation11 + $0x130] sm:$0xff]  ;;  %v1047_v50 = vld [vmem:[#allocation11 + $0x88] sm:$0xff] }
 0x12a   :  { %1167 = vmatpush.msrb.mxu1 %v1054_v51  ;;  %v1044_v61 = vld [vmem:[#allocation11 + $0x70] sm:$0xff]  ;;  %v1094_v51 = vld [vmem:[#allocation11 + $0x200] sm:$0xff] }
 0x12b   :  { %1192 = vmatpush.msra.mxu2 %v1076_v52  ;;  %1205 = vmatpush.msrb.mxu3 %v1122_v60  ;;  %v1120_v62 = vld [vmem:[#allocation11 + $0x2d0] sm:$0xff]  ;;  %v1123_v60 = vld [vmem:[#allocation11 + $0x2e8] sm:$0xff] }
 0x12c   :  { %1168 = vmatpush.msrb.mxu1 %v1052_v53  ;;  %v1064_v1 = vld [vmem:[#allocation11 + $0x110] sm:$0xff]  ;;  %v1069_v53 = vld [vmem:[#allocation11 + $0x138] sm:$0xff] }
 0x12d   :  { %1193 = vmatpush.msra.mxu2 %v1074_v47  ;;  %1206 = vmatpush.msrb.mxu3 %v1120_v62  ;;  %v1040_v2 = vld [vmem:[#allocation11 + $0x50] sm:$0xff]  ;;  %v1125_v47 = vld [vmem:[#allocation11 + $0x2f8] sm:$0xff] }
 0x12e   :  { %1169 = vmatpush.msrb.mxu1 %v1050_v54  ;;  %v1116_v5 = vld [vmem:[#allocation11 + $0x2b0] sm:$0xff]  ;;  %v616_v54 = vperm.slane %v1852_v24, 1 }
 0x12f   :  { %1194 = vmatpush.msra.mxu2 %v1072_v55  ;;  %1207 = vmatpush.msrb.mxu3 %v1118_v3  ;;  %v1036_v9 = vld [vmem:[#allocation11 + $0x30] sm:$0xff]  ;;  %v1121_v3 = vld [vmem:[#allocation11 + $0x2d8] sm:$0xff] }
 0x130   :  { %1170 = vmatpush.msrb.mxu1 %v1048_v56  ;;  %v1112_v11 = vld [vmem:[#allocation11 + $0x290] sm:$0xff]  ;;  %v1045_v56 = vld [vmem:[#allocation11 + $0x78] sm:$0xff] }
 0x131   :  { %1195 = vmatpush.msra.mxu2 %v1070_v58  ;;  %1208 = vmatpush.msrb.mxu3 %v1116_v5  ;;  %v1032_v14 = vld [vmem:[#allocation11 + $0x10] sm:$0xff] }
 0x132   :  { %1171 = vmatpush.msrb.mxu1 %v1046_v59  ;;  %v1108_v23 = vld [vmem:[#allocation11 + $0x270] sm:$0xff]  ;;  %v1067_v59 = vld [vmem:[#allocation11 + $0x128] sm:$0xff] }
 0x133   :  { %1196 = vmatpush.msra.mxu2 %v1068_v17  ;;  %1209 = vmatpush.msrb.mxu3 %v1114_v8  ;;  %v1104_v29 = vld [vmem:[#allocation11 + $0x250] sm:$0xff]  ;;  %v1119_v8 = vld [vmem:[#allocation11 + $0x2c8] sm:$0xff] }
 0x134   :  { %1172 = vmatpush.msrb.mxu1 %v1044_v61  ;;  %v1100_v37 = vld [vmem:[#allocation11 + $0x230] sm:$0xff]  ;;  %v1043_v61 = vld [vmem:[#allocation11 + $0x68] sm:$0xff] }
 0x135   :  { %1197 = vmatpush.msra.mxu2 %v1066_v63  ;;  %1210 = vmatpush.msrb.mxu3 %v1112_v11  ;;  %v1096_v44 = vld [vmem:[#allocation11 + $0x210] sm:$0xff]  ;;  %v1041_v63 = vld [vmem:[#allocation11 + $0x58] sm:$0xff] }
 0x136   :  { %1173 = vmatpush.msrb.mxu1 %v1042_v0  ;;  %v1156_v45 = vld [vmem:[#allocation11 + $0x3f0] sm:$0xff]  ;;  %v1065_v0 = vld [vmem:[#allocation11 + $0x118] sm:$0xff] }
 0x137   :  { %1198 = vmatpush.msra.mxu2 %v1064_v1  ;;  %1211 = vmatpush.msrb.mxu3 %v1110_v18  ;;  %v1035_v18 = vld [vmem:[#allocation11 + $0x28] sm:$0xff] }
 0x138   :  { %1174 = vmatpush.msrb.mxu1 %v1040_v2  ;;  %v643_v32 = vpop.f32.mrf.mxu1  ;;  %1224 = vmatpush.msrb.mxu0 %v1156_v45  ;;  %v1154_v2 = vld [vmem:[#allocation11 + $0x3e0] sm:$0xff]  ;;  %v1128_v45 = vld [vmem:[#allocation11 + $0x310] sm:$0xff] }
 0x139   :  { %1199 = vmatpush.msra.mxu2 %v1062_v4  ;;  %1212 = vmatpush.msrb.mxu3 %v1108_v23  ;;  %v644_v48 = vadd.f32 %v643_v32, %v615_v30  ;;  %v1152_v4 = vld [vmem:[#allocation11 + $0x3d0] sm:$0xff]  ;;  %v1033_v23 = vld [vmem:[#allocation11 + $0x18] sm:$0xff] }
 0x13a   :  { %1175 = vmatpush.msrb.mxu1 %v1038_v6  ;;  %v1063_v6 = vld [vmem:[#allocation11 + $0x108] sm:$0xff]  ;;  %1225 = vmatpush.msrb.mxu0 %v1154_v2  ;;  %v1144_v30 = vld [vmem:[#allocation11 + $0x390] sm:$0xff]  ;;  %v1141_v2 = vld [vmem:[#allocation11 + $0x378] sm:$0xff] }
 0x13b   :  { %1264 = vmatpush.msrb.mxu2 %v1093_v7  ;;  %1213 = vmatpush.msrb.mxu3 %v1106_v26  ;;  %v1039_v7 = vld [vmem:[#allocation11 + $0x48] sm:$0xff] }
 0x13c   :  { %1176 = vmatpush.msrb.mxu1 %v1036_v9  ;;  %1226 = vmatpush.msrb.mxu0 %v1152_v4  ;;  %v1139_v4 = vld [vmem:[#allocation11 + $0x368] sm:$0xff] }
 0x13d   :  { %1265 = vmatpush.msrb.mxu2 %v1091_v10  ;;  %1214 = vmatpush.msrb.mxu3 %v1104_v29  ;;  %v1150_v10 = vld [vmem:[#allocation11 + $0x3c0] sm:$0xff] }
 0x13e   :  { %1177 = vmatpush.msrb.mxu1 %v1034_v12  ;;  %v1037_v12 = vld [vmem:[#allocation11 + $0x38] sm:$0xff]  ;;  %1227 = vmatpush.msrb.mxu0 %v1150_v10 }
 0x13f   :  { %1266 = vmatpush.msrb.mxu2 %v1089_v13  ;;  %1215 = vmatpush.msrb.mxu3 %v1102_v34  ;;  %v1117_v13 = vld [vmem:[#allocation11 + $0x2b8] sm:$0xff] }
 0x140   :  { %1178 = vmatpush.msrb.mxu1 %v1032_v14  ;;  %v1109_v34 = vld [vmem:[#allocation11 + $0x278] sm:$0xff] }
 0x141   :  { %1267 = vmatpush.msrb.mxu2 %v1087_v16  ;;  %1216 = vmatpush.msrb.mxu3 %v1100_v37  ;;  %v1105_v37 = vld [vmem:[#allocation11 + $0x258] sm:$0xff] }
 0x142   :  { %1179 = vmatpush.msrb.mxu1 %v1030_v19  ;;  %v1148_v19 = vld [vmem:[#allocation11 + $0x3b0] sm:$0xff]  ;;  %v1129_v10 = vld [vmem:[#allocation11 + $0x318] sm:$0xff] }
 0x143   :  { %1268 = vmatpush.msrb.mxu2 %v1085_v20  ;;  %1217 = vmatpush.msrb.mxu3 %v1098_v40  ;;  %v1115_v20 = vld [vmem:[#allocation11 + $0x2a8] sm:$0xff]  ;;  %v1101_v40 = vld [vmem:[#allocation11 + $0x238] sm:$0xff] }
 0x144   :  { %1244 = vmatpush.msra.mxu1 %v1061_v21  ;;  %v1146_v21 = vld [vmem:[#allocation11 + $0x3a0] sm:$0xff]  ;;  %1228 = vmatpush.msrb.mxu0 %v1148_v19 }
 0x145   :  { %1269 = vmatpush.msrb.mxu2 %v1083_v22  ;;  %v663_v35 = vpop.f32.mrf.mxu2  ;;  %v683_v46 = vpop.f32.mrf.mxu3  ;;  %1218 = vmatpush.msrb.mxu3 %v1096_v44  ;;  %v1097_v44 = vld [vmem:[#allocation11 + $0x218] sm:$0xff] }
 0x146   :  { %1245 = vmatpush.msra.mxu1 %v1059_v25  ;;  %v664_v41 = vadd.f32 %v663_v35, %v644_v48  ;;  %v1113_v25 = vld [vmem:[#allocation11 + $0x298] sm:$0xff]  ;;  %1229 = vmatpush.msrb.mxu0 %v1146_v21  ;;  %v1140_v35 = vld [vmem:[#allocation11 + $0x370] sm:$0xff] }
 0x147   :  { %1270 = vmatpush.msrb.mxu2 %v1081_v27  ;;  %1219 = vmatpush.msrb.mxu3 %v1094_v51  ;;  %v1136_v48 = vld [vmem:[#allocation11 + $0x350] sm:$0xff]  ;;  %v1155_v51 = vld [vmem:[#allocation11 + $0x3e8] sm:$0xff] }
 0x148   :  { %1246 = vmatpush.msra.mxu1 %v1057_v28  ;;  %v684_v52 = vadd.f32 %v683_v46, %v664_v41  ;;  %v1031_v28 = vld [vmem:[#allocation11 + $0x8] sm:$0xff]  ;;  %1230 = vmatpush.msrb.mxu0 %v1144_v30  ;;  %v1132_v41 = vld [vmem:[#allocation11 + $0x330] sm:$0xff] }
 0x149   :  { %1271 = vmatpush.msrb.mxu2 %v1079_v31  ;;  %1284 = vmatpush.msra.mxu3 %v1125_v47  ;;  %v1111_v31 = vld [vmem:[#allocation11 + $0x288] sm:$0xff]  ;;  %v617_v47 = vperm.slane %v1852_v24, 2 }
 0x14a   :  { %1247 = vmatpush.msra.mxu1 %v1055_v33  ;;  %v1142_v33 = vld [vmem:[#allocation11 + $0x380] sm:$0xff]  ;;  %v1095_v46 = vld [vmem:[#allocation11 + $0x208] sm:$0xff] }
 0x14b   :  { %1272 = vmatpush.msrb.mxu2 %v1077_v36  ;;  %1285 = vmatpush.msra.mxu3 %v1123_v60  ;;  %v1107_v36 = vld [vmem:[#allocation11 + $0x268] sm:$0xff] }
 0x14c   :  { %1248 = vmatpush.msra.mxu1 %v1053_v38  ;;  %1231 = vmatpush.msrb.mxu0 %v1142_v33  ;;  %v1138_v38 = vld [vmem:[#allocation11 + $0x360] sm:$0xff]  ;;  %v1356_v33 = vld [vmem:[#allocation14 + $0xf0] sm:$0xff] }
 0x14d   :  { %1273 = vmatpush.msrb.mxu2 %v1075_v15  ;;  %v743_v57 = vpop.f32.mrf.mxu2  ;;  %1286 = vmatpush.msra.mxu3 %v1121_v3  ;;  %v1103_v15 = vld [vmem:[#allocation11 + $0x248] sm:$0xff] }
 0x14e   :  { %1249 = vmatpush.msra.mxu1 %v1051_v39  ;;  %v744_v1 = vadd.f32 %v743_v57, %v616_v54  ;;  %v763_v9 = vpop.f32.mrf.mxu3  ;;  %1232 = vmatpush.msrb.mxu0 %v1140_v35  ;;  %v1134_v39 = vld [vmem:[#allocation11 + $0x340] sm:$0xff]  ;;  %v1355_v35 = vld [vmem:[#allocation14 + $0xe8] sm:$0xff] }
 0x14f   :  { %1274 = vmatpush.msrb.mxu2 %v1073_v42  ;;  %1287 = vmatpush.msra.mxu3 %v1119_v8  ;;  %v1099_v42 = vld [vmem:[#allocation11 + $0x228] sm:$0xff]  ;;  %v1133_v8 = vld [vmem:[#allocation11 + $0x338] sm:$0xff] }
 0x150   :  { %1250 = vmatpush.msra.mxu1 %v1049_v43  ;;  %v703_v55 = vpop.f32.mrf.mxu0  ;;  %v764_v11 = vadd.f32 %v763_v9, %v744_v1  ;;  %1233 = vmatpush.msrb.mxu0 %v1138_v38  ;;  %v1130_v43 = vld [vmem:[#allocation11 + $0x320] sm:$0xff]  ;;  %v1131_v9 = vld [vmem:[#allocation11 + $0x328] sm:$0xff] }
 0x151   :  { %1275 = vmatpush.msrb.mxu2 %v1071_v49  ;;  %v704_v58 = vadd.f32 %v703_v55, %v684_v52  ;;  %1288 = vmatpush.msra.mxu3 %v1117_v13  ;;  %v1126_v49 = vld [vmem:[#allocation11 + $0x300] sm:$0xff]  ;;  %v1153_v52 = vld [vmem:[#allocation11 + $0x3d8] sm:$0xff] }
 0x152   :  { %1251 = vmatpush.msra.mxu1 %v1047_v50  ;;  %v723_v17 = vpop.f32.mrf.mxu1  ;;  %1234 = vmatpush.msrb.mxu0 %v1136_v48  ;;  %v1157_v50 = vld [vmem:[#allocation11 + $0x3f8] sm:$0xff]  ;;  %v1338_v30 = vld [vmem:[#allocation14 + $0x60] sm:$0xff] }
 0x153   :  { %1276 = vmatpush.msrb.mxu2 %v1069_v53  ;;  %v724_v62 = vadd.f32 %v723_v17, %v704_v58  ;;  %1289 = vmatpush.msra.mxu3 %v1115_v20  ;;  %v1151_v53 = vld [vmem:[#allocation11 + $0x3c8] sm:$0xff]  ;;  %v1145_v17 = vld [vmem:[#allocation11 + $0x398] sm:$0xff] }
 0x154   :  { %1252 = vmatpush.msra.mxu1 %v1045_v56  ;;  %1235 = vmatpush.msrb.mxu0 %v1134_v39  ;;  %v1149_v56 = vld [vmem:[#allocation11 + $0x3b8] sm:$0xff]  ;;  %v1147_v58 = vld [vmem:[#allocation11 + $0x3a8] sm:$0xff] }
 0x155   :  { %1277 = vmatpush.msrb.mxu2 %v1067_v59  ;;  %v1026_v5 = vmax.f32 %v724_v62, 0.0  ;;  %1290 = vmatpush.msra.mxu3 %v1113_v25  ;;  %v1354_v38 = vld [vmem:[#allocation14 + $0xe0] sm:$0xff]  ;;  %v1353_v48 = vld [vmem:[#allocation14 + $0xd8] sm:$0xff]  ;;  %v1352_v39 = vld [vmem:[#allocation14 + $0xd0] sm:$0xff] }
 0x156   :  { %1253 = vmatpush.msra.mxu1 %v1043_v61  ;;  %1236 = vmatpush.msrb.mxu0 %v1132_v41  ;;  %v1351_v41 = vld [vmem:[#allocation14 + $0xc8] sm:$0xff] }
 0x157   :  { %1278 = vmatpush.msrb.mxu2 %v1065_v0  ;;  %1180 = vmatmul.f32.vlgmr.msrb.gmra.mxu1 %v1026_v5 }
 0x158   :  { %1254 = vmatpush.msra.mxu1 %v1041_v63  ;;  %1291 = vmatpush.msra.mxu3 %v1111_v31  ;;  %v1143_v63 = vld [vmem:[#allocation11 + $0x388] sm:$0xff]  ;;  %v1357_v31 = vld [vmem:[#allocation14 + $0xf8] sm:$0xff] }
 0x159   :  { %1279 = vmatpush.msrb.mxu2 %v1063_v6  ;;  %v783_v14 = vpop.f32.mrf.mxu0  ;;  %1237 = vmatpush.msrb.mxu0 %v1130_v43  ;;  %v1137_v6 = vld [vmem:[#allocation11 + $0x358] sm:$0xff]  ;;  %v1350_v43 = vld [vmem:[#allocation14 + $0xc0] sm:$0xff] }
 0x15a   :  { %1255 = vmatpush.msra.mxu1 %v1039_v7  ;;  %v784_v16 = vadd.f32 %v783_v14, %v764_v11  ;;  %1292 = vmatpush.msra.mxu3 %v1109_v34  ;;  %v1135_v7 = vld [vmem:[#allocation11 + $0x348] sm:$0xff] }
 0x15b   :  { %1238 = vmatpush.msrb.mxu0 %v1128_v45  ;;  %v1127_v11 = vld [vmem:[#allocation11 + $0x308] sm:$0xff]  ;;  %v1349_v45 = vld [vmem:[#allocation14 + $0xb8] sm:$0xff] }
 0x15c   :  { %1256 = vmatpush.msra.mxu1 %v1037_v12  ;;  %v803_v22 = vpop.f32.mrf.mxu1  ;;  %1293 = vmatpush.msra.mxu3 %v1107_v36  ;;  %v618_v12 = vperm.slane %v1852_v24, 3  ;;  %v1337_v24 = vld [vmem:[#allocation14 + $0x58] sm:$0xff]  ;;  %v1335_v34 = vld [vmem:[#allocation14 + $0x48] sm:$0xff]  ;;  %v1334_v36 = vld [vmem:[#allocation14 + $0x40] sm:$0xff] }
 0x15d   :  { %v804_v26 = vadd.f32 %v803_v22, %v784_v16  ;;  %v823_v27 = vpop.f32.mrf.mxu2  ;;  %1239 = vmatpush.msrb.mxu0 %v1126_v49  ;;  %v1348_v49 = vld [vmem:[#allocation14 + $0xb0] sm:$0xff] }
 0x15e   :  { %1257 = vmatpush.msra.mxu1 %v1035_v18  ;;  %1294 = vmatpush.msra.mxu3 %v1105_v37  ;;  %v1333_v37 = vld [vmem:[#allocation14 + $0x38] sm:$0xff] }
 0x15f   :  { %v824_v29 = vadd.f32 %v823_v27, %v804_v26  ;;  %1304 = vmatpush.msra.mxu0 %v1157_v50  ;;  %v1341_v27 = vld [vmem:[#allocation14 + $0x78] sm:$0xff]  ;;  %v1327_v50 = vld [vmem:[#allocation14 + $0x8] sm:$0xff] }
 0x160   :  { %1258 = vmatpush.msra.mxu1 %v1033_v23  ;;  %1295 = vmatpush.msra.mxu3 %v1103_v15  ;;  %v1332_v15 = vld [vmem:[#allocation14 + $0x30] sm:$0xff] }
 0x161   :  { %v1027_v32 = vmax.f32 %v824_v29, 0.0  ;;  %1305 = vmatpush.msra.mxu0 %v1155_v51  ;;  %v1339_v29 = vld [vmem:[#allocation14 + $0x68] sm:$0xff] }
 0x162   :  { %1259 = vmatpush.msra.mxu1 %v1031_v28  ;;  %1296 = vmatpush.msra.mxu3 %v1101_v40  ;;  %v1340_v28 = vld [vmem:[#allocation14 + $0x70] sm:$0xff]  ;;  %v1331_v40 = vld [vmem:[#allocation14 + $0x28] sm:$0xff] }
 0x163   :  { %1260 = vmatmul.f32.vlgmr.msra.gmra.mxu1 %v1026_v5  ;;  %1200 = vmatmul.f32.vlgmr.msra.gmra.mxu2 %v1027_v32  ;;  %v1347_v51 = vld [vmem:[#allocation14 + $0xa8] sm:$0xff] }
 0x164   :  { %1297 = vmatpush.msra.mxu3 %v1099_v42  ;;  %1306 = vmatpush.msra.mxu0 %v1153_v52  ;;  %v1330_v42 = vld [vmem:[#allocation14 + $0x20] sm:$0xff] }
 0x165   :  { %1362 = vmatpush.msrb.mxu1 %v1341_v27  ;;  %1382 = vmatpush.msra.mxu2 %v1357_v31  ;;  %v1326_v52 = vld [vmem:[#allocation14] sm:$0xff] }
 0x166   :  { %1298 = vmatpush.msra.mxu3 %v1097_v44  ;;  %1307 = vmatpush.msra.mxu0 %v1151_v53  ;;  %v1329_v44 = vld [vmem:[#allocation14 + $0x18] sm:$0xff]  ;;  %v1346_v53 = vld [vmem:[#allocation14 + $0xa0] sm:$0xff] }
 0x167   :  { %1363 = vmatpush.msrb.mxu1 %v1340_v28  ;;  %1383 = vmatpush.msra.mxu2 %v1356_v33 }
 0x168   :  { %1299 = vmatpush.msra.mxu3 %v1095_v46  ;;  %1308 = vmatpush.msra.mxu0 %v1149_v56  ;;  %v1328_v46 = vld [vmem:[#allocation14 + $0x10] sm:$0xff]  ;;  %v1342_v56 = vld [vmem:[#allocation14 + $0x80] sm:$0xff] }
 0x169   :  { %v843_v54 = vpop.f32.mrf.mxu3  ;;  %1364 = vmatpush.msrb.mxu1 %v1339_v29  ;;  %1384 = vmatpush.msra.mxu2 %v1355_v35 }
 0x16a   :  { %v844_v57 = vadd.f32 %v843_v54, %v617_v47  ;;  %1309 = vmatpush.msra.mxu0 %v1147_v58  ;;  %v1345_v47 = vld [vmem:[#allocation14 + $0x98] sm:$0xff]  ;;  %v1344_v54 = vld [vmem:[#allocation14 + $0x90] sm:$0xff] }
 0x16b   :  { %1280 = vmatmul.f32.vlgmr.msrb.gmra.mxu2 %v1027_v32  ;;  %1365 = vmatpush.msrb.mxu1 %v1338_v30  ;;  %v1336_v32 = vld [vmem:[#allocation14 + $0x50] sm:$0xff] }
 0x16c   :  { %1310 = vmatpush.msra.mxu0 %v1145_v17  ;;  %1385 = vmatpush.msra.mxu2 %v1354_v38 }
 0x16d   :  { %1366 = vmatpush.msrb.mxu1 %v1337_v24 }
 0x16e   :  { %1311 = vmatpush.msra.mxu0 %v1143_v63  ;;  %1386 = vmatpush.msra.mxu2 %v1353_v48 }
 0x16f   :  { %1367 = vmatpush.msrb.mxu1 %v1336_v32 }
 0x170   :  { %1312 = vmatpush.msra.mxu0 %v1141_v2  ;;  %1387 = vmatpush.msra.mxu2 %v1352_v39 }
 0x171   :  { %1368 = vmatpush.msrb.mxu1 %v1335_v34 }
 0x172   :  { %1313 = vmatpush.msra.mxu0 %v1139_v4  ;;  %1388 = vmatpush.msra.mxu2 %v1351_v41 }
 0x173   :  { %v863_v55 = vpop.f32.mrf.mxu0  ;;  %1369 = vmatpush.msrb.mxu1 %v1334_v36 }
 0x174   :  { %v864_v59 = vadd.f32 %v863_v55, %v844_v57  ;;  %1314 = vmatpush.msra.mxu0 %v1137_v6  ;;  %1389 = vmatpush.msra.mxu2 %v1350_v43  ;;  %v1343_v55 = vld [vmem:[#allocation14 + $0x88] sm:$0xff]  ;;  %v1158_v57 = vld [vmem:[#allocation13] sm:$0x3] }
 0x175   :  { %1370 = vmatpush.msrb.mxu1 %v1333_v37  ;;  %v1161_v63 = vperm.slane %v1158_v57, 1 }
 0x176   :  { %1315 = vmatpush.msra.mxu0 %v1135_v7  ;;  %1390 = vmatpush.msra.mxu2 %v1349_v45 }
 0x177   :  { %1371 = vmatpush.msrb.mxu1 %v1332_v15 }
 0x178   :  { %1316 = vmatpush.msra.mxu0 %v1133_v8  ;;  %1391 = vmatpush.msra.mxu2 %v1348_v49 }
 0x179   :  { %v903_v62 = vpop.f32.mrf.mxu2  ;;  %1372 = vmatpush.msrb.mxu1 %v1331_v40 }
 0x17a   :  { %v923_v1 = vpop.f32.mrf.mxu3  ;;  %1317 = vmatpush.msra.mxu0 %v1131_v9  ;;  %1392 = vmatpush.msra.mxu2 %v1347_v51 }
 0x17b   :  { %1373 = vmatpush.msrb.mxu1 %v1330_v42 }
 0x17c   :  { %1318 = vmatpush.msra.mxu0 %v1129_v10  ;;  %1393 = vmatpush.msra.mxu2 %v1346_v53 }
 0x17d   :  { %1374 = vmatpush.msrb.mxu1 %v1329_v44 }
 0x17e   :  { %1319 = vmatpush.msra.mxu0 %v1127_v11  ;;  %1394 = vmatpush.msra.mxu2 %v1345_v47 }
 0x17f   :  { %v883_v60 = vpop.f32.mrf.mxu1  ;;  %1375 = vmatpush.msrb.mxu1 %v1328_v46 }
 0x180   :  { %v884_v61 = vadd.f32 %v883_v60, %v864_v59  ;;  %1395 = vmatpush.msra.mxu2 %v1344_v54  ;;  %v1160_v59 = vperm.slane %v1158_v57, 0 }
 0x181   :  { %1376 = vmatpush.msrb.mxu1 %v1327_v50 }
 0x182   :  { %v904_v0 = vadd.f32 %v903_v62, %v884_v61  ;;  %1396 = vmatpush.msra.mxu2 %v1343_v55 }
 0x183   :  { %1377 = vmatpush.msrb.mxu1 %v1326_v52 }
 0x184   :  { %v924_v3 = vadd.f32 %v923_v1, %v904_v0  ;;  %1397 = vmatpush.msra.mxu2 %v1342_v56 }
 0x186   :  { %v1028_v5 = vmax.f32 %v924_v3, 0.0 }
 0x188   :  { %1220 = vmatmul.f32.vlgmr.msrb.gmra.mxu3 %v1028_v5 }
 0x190   :  { %1300 = vmatmul.f32.vlgmr.msra.gmra.mxu3 %v1028_v5 }
 0x195   :  { %v943_v13 = vpop.f32.mrf.mxu0 }
 0x196   :  { %v944_v14 = vadd.f32 %v943_v13, %v618_v12  ;;  %v1451_v13 = vld [vmem:[#allocation16] ss:$0 sm:$0xff] }
 0x19b   :  { %v983_v19 = vpop.f32.mrf.mxu2 }
 0x19c   :  { %v1003_v21 = vpop.f32.mrf.mxu3 }
 0x1a0   :  { %v963_v16 = vpop.f32.mrf.mxu1 }
 0x1a1   :  { %v964_v18 = vadd.f32 %v963_v16, %v944_v14 }
 0x1a3   :  { %v984_v20 = vadd.f32 %v983_v19, %v964_v18 }
 0x1a5   :  { %v1004_v22 = vadd.f32 %v1003_v21, %v984_v20  ;;  %v1023_v23 = vpop.f32.mrf.mxu0 }
 0x1a7   :  { %v1024_v25 = vadd.f32 %v1023_v23, %v1004_v22 }
 0x1a9   :  { %v1029_v26 = vmax.f32 %v1024_v25, 0.0 }
 0x1ab   :  { %1240 = vmatmul.f32.vlgmr.msrb.gmra.mxu0 %v1029_v26 }
 0x1b3   :  { %1320 = vmatmul.f32.vlgmr.msra.gmra.mxu0 %v1029_v26 }
 0x1d4   :  { %v1181_v58 = vpop.f32.mrf.mxu1 }
 0x1d5   :  { %v1182_v61 = vadd.f32 %v1181_v58, %v1160_v59 }
 0x1e0   :  { %v1261_v1 = vpop.f32.mrf.mxu1 }
 0x1e1   :  { %v1262_v5 = vadd.f32 %v1261_v1, %v1161_v63 }
 0x1e6   :  { %v1201_v60 = vpop.f32.mrf.mxu2 }
 0x1e7   :  { %v1202_v62 = vadd.f32 %v1201_v60, %v1182_v61 }
 0x1ee   :  { %v1281_v4 = vpop.f32.mrf.mxu2 }
 0x1ef   :  { %v1282_v8 = vadd.f32 %v1281_v4, %v1262_v5 }
 0x20b   :  { %v1221_v17 = vpop.f32.mrf.mxu3 }
 0x20c   :  { %v1222_v0 = vadd.f32 %v1221_v17, %v1202_v62 }
 0x213   :  { %v1301_v7 = vpop.f32.mrf.mxu3 }
 0x214   :  { %v1302_v9 = vadd.f32 %v1301_v7, %v1282_v8 }
 0x228   :  { %v1241_v2 = vpop.f32.mrf.mxu0 }
 0x229   :  { %v1242_v3 = vadd.f32 %v1241_v2, %v1222_v0 }
 0x22b   :  { %v1324_v6 = vmax.f32 %v1242_v3, 0.0 }
 0x22d   :  { %1378 = vmatmul.f32.vlgmr.msrb.gmra.mxu1 %v1324_v6 }
 0x230   :  { %v1321_v10 = vpop.f32.mrf.mxu0 }
 0x231   :  { %v1322_v11 = vadd.f32 %v1321_v10, %v1302_v9 }
 0x233   :  { %v1325_v12 = vmax.f32 %v1322_v11, 0.0 }
 0x235   :  { %1398 = vmatmul.f32.vlgmr.msra.gmra.mxu2 %v1325_v12 }
 0x2aa   :  { %v1379_v14 = vpop.f32.mrf.mxu1 }
 0x2ab   :  { %v1380_v16 = vadd.f32 %v1451_v13, %v1379_v14 }
 0x2b8   :  { %v1399_v18 = vpop.f32.mrf.mxu2 }
 0x2b9   :  { %v1400_v19 = vadd.f32 %v1399_v18, %v1380_v16 }
 0x2bb   :  { %1402 = vst [vmem:[#allocation17] sm:$0xff] %v1400_v19 }
 0x2bc   :  { %1413 = dma.vmem_to_hbm [thread:$0]  %s1409_s8, 128, %s1411_s13, [#allocation4]  }
 0x2bd   :  { %1702 = dma.done.wait [#allocation4], 128  }
 0x2be   :  { %1703 = vsyncadd [#allocation4], 4294967168 }
 0x2bf   :  { %1418 = vsyncpa [#allocation3], 1 }
 0x2c0   :  { %1419 = vsyncpa [#allocation6], 1 }
 0x2c1   :  { %1420 = vsyncpa [#allocation9], 1 }
 0x2c2   :  { %1421 = vsyncpa [#allocation12], 1 }
 0x2c3   :  { %1422 = vsyncpa [#allocation15], 1 }
 0x2c4   :  { %1423 = vsyncpa [#allocation4], 1 }

</bundles_post_ra>
